<compile_context>
chip_gen: v5e
topology: v5e:2x2
jax: 0.10.0
libtpu: 0.0.40
codegen_flags: <defaults>
</compile_context>

<pallas_src>
import jax
import jax.numpy as jnp
from jax.experimental import pallas as pl
from jax.experimental.pallas import tpu as pltpu

# MXU/VPU friendly padded hidden sizes: 1000 -> 1024, 400 -> 512, 100 -> 128.
H1, H2, H3 = 1024, 512, 128


def _round_up(n, m):
    return ((n + m - 1) // m) * m


def _discriminator_kernel(xz_ref, w1_ref, b1_ref, w2_ref, b2_ref,
                          w3_ref, b3_ref, w4_ref, b4_ref, out_ref):
    xz = xz_ref[...]                                        # (TB, 4)   f32
    w1 = w1_ref[...]                                        # (4, H1)   f32

    # Layer 1 (K=4): VPU broadcast-FMAs -- an MXU pass would use <4% of its rows.
    h = b1_ref[...]                                         # (1, H1)   f32
    for k in range(xz.shape[1]):                            # unrolled, 4 terms
        h = h + xz[:, k:k + 1] * w1[k:k + 1, :]             # (TB, H1)  f32
    h = jnp.maximum(h, 0.0)

    # Layer 2: 1024 -> 512. bf16 MXU operands, f32 accumulate, f32 bias+ReLU.
    h = jnp.dot(h.astype(jnp.bfloat16), w2_ref[...],
                preferred_element_type=jnp.float32) + b2_ref[...]
    h = jnp.maximum(h, 0.0)                                 # (TB, H2)  f32

    # Layer 3: 512 -> 128. bf16 MXU operands, f32 accumulate.
    h = jnp.dot(h.astype(jnp.bfloat16), w3_ref[...],
                preferred_element_type=jnp.float32) + b3_ref[...]
    h = jnp.maximum(h, 0.0)                                 # (TB, H3)  f32

    # Layer 4 (N=1): VPU multiply + lane reduction instead of an MXU dot that
    # would keep only 1 of 128 result lanes.
    out_ref[...] = (jnp.sum(h * w4_ref[...], axis=-1, keepdims=True)
                    + b4_ref[...])                          # (TB, 1)   f32


def discriminator_forward(x, z, prepared, *, tile_b=256):
    """x: (B, feature_dim), z: (B, z_dim). Returns squeeze of (B, 1)."""
    xz = jnp.concatenate(
        [x.astype(jnp.float32), z.astype(jnp.float32)], axis=1)   # (B, 4)
    B, d_in = xz.shape

    tile_b = min(tile_b, _round_up(B, 8))        # sublane-aligned batch tile
    bp = _round_up(B, tile_b)
    if bp != B:
        xz = jnp.pad(xz, ((0, bp - B), (0, 0)))  # zero rows, sliced off below
    grid = (bp // tile_b,)

    def w_spec(shape):
        # weights/biases: whole array, constant block index -> VMEM resident.
        return pl.BlockSpec(shape, lambda i: (0, 0))

    in_specs = [
        pl.BlockSpec((tile_b, d_in), lambda i: (i, 0)),      # xz batch tile
        w_spec((d_in, H1)), w_spec((1, H1)),
        w_spec((H1, H2)), w_spec((1, H2)),
        w_spec((H2, H3)), w_spec((1, H3)),
        w_spec((1, H3)), w_spec((1, 1)),
    ]
    out_spec = pl.BlockSpec((tile_b, 1), lambda i: (i, 0))

    weight_bytes = (d_in * H1 * 4 + H1 * 4 + H1 * H2 * 2 + H2 * 4
                    + H2 * H3 * 2 + H3 * 4 + H3 * 4 + 4)
    cost = pl.CostEstimate(
        flops=2 * bp * (d_in * H1 + H1 * H2 + H2 * H3 + H3),
        transcendentals=0,
        bytes_accessed=weight_bytes + bp * (d_in + 1) * 4)

    out = pl.pallas_call(
        _discriminator_kernel,
        out_shape=jax.ShapeDtypeStruct((bp, 1), jnp.float32),
        grid=grid,
        in_specs=in_specs,
        out_specs=out_spec,
        compiler_params=pltpu.CompilerParams(
            dimension_semantics=("parallel",),          # megacore / v7x 2xTC
            vmem_limit_bytes=32 * 1024 * 1024),
        cost_estimate=cost,
    )(xz, prepared["w1"], prepared["b1"], prepared["w2"], prepared["b2"],
      prepared["w3"], prepared["b3"], prepared["w4"], prepared["b4"])

    return jnp.squeeze(out[:B])   # matches torch .squeeze()


def init_params(key, feature_dim=2, z_dim=2):
    """Deterministic synthetic weights (PyTorch-style uniform fan-in init),
    stored transposed as (in, out), at the *real* (unpadded) sizes."""
    dims = [feature_dim + z_dim, 1000, 400, 100, 1]
    params = {}
    for i in range(4):
        key, kw, kb = jax.random.split(key, 3)
        fan_in, fan_out = dims[i], dims[i + 1]
        bound = 1.0 / jnp.sqrt(fan_in)
        params[f"w{i+1}"] = jax.random.uniform(
            kw, (fan_in, fan_out), jnp.float32, -bound, bound)
        params[f"b{i+1}"] = jax.random.uniform(
            kb, (1, fan_out), jnp.float32, -bound, bound)
    return params


def prepare_params(params):
    """Zero-pad hidden dims to 1024/512/128 (inert: ReLU(0)=0 and padded
    weight rows hit zero activations) and cast the big MXU weights to bf16."""
    d_in = params["w1"].shape[0]

    def pad(a, shape):
        return jnp.pad(a, [(0, s - d) for d, s in zip(a.shape, shape)])

    return {
        "w1": pad(params["w1"], (d_in, H1)).astype(jnp.float32),   # VPU layer
        "b1": pad(params["b1"], (1, H1)).astype(jnp.float32),
        "w2": pad(params["w2"], (H1, H2)).astype(jnp.bfloat16),    # MXU layer
        "b2": pad(params["b2"], (1, H2)).astype(jnp.float32),
        "w3": pad(params["w3"], (H2, H3)).astype(jnp.bfloat16),    # MXU layer
        "b3": pad(params["b3"], (1, H3)).astype(jnp.float32),
        "w4": pad(params["w4"].T, (1, H3)).astype(jnp.float32),    # VPU layer
        "b4": params["b4"].reshape(1, 1).astype(jnp.float32),
    }


if __name__ == "__main__":
    key = jax.random.PRNGKey(0)
    kp, kx, kz = jax.random.split(key, 3)

    feature_dim, z_dim, batch = 2, 2, 8
    params = init_params(kp, feature_dim=feature_dim, z_dim=z_dim)
    prepared = prepare_params(params)

    x = jax.random.normal(kx, (batch, feature_dim), jnp.float32)
    z = jax.random.normal(kz, (batch, z_dim), jnp.float32)

    out = discriminator_forward(x, z, prepared)
    out = jax.block_until_ready(out)

    # plain-JAX f32 reference with the unpadded weights
    def ref(x, z, p):
        h = jnp.concatenate([x, z], axis=1)
        h = jnp.maximum(h @ p["w1"] + p["b1"], 0.0)
        h = jnp.maximum(h @ p["w2"] + p["b2"], 0.0)
        h = jnp.maximum(h @ p["w3"] + p["b3"], 0.0)
        return jnp.squeeze(h @ p["w4"] + p["b4"])

    expected = ref(x, z, params)
    assert out.shape == (batch,)
    # bf16 MXU operands (f32 accumulation) vs. f32 reference -> loose tolerance
    assert jnp.allclose(out, expected, atol=5e-2, rtol=5e-2)

    # also exercise the multi-tile grid + batch-padding path
    kx2, kz2 = jax.random.split(kx)
    x2 = jax.random.normal(kx2, (300, feature_dim), jnp.float32)
    z2 = jax.random.normal(kz2, (300, z_dim), jnp.float32)
    out2 = jax.block_until_ready(discriminator_forward(x2, z2, prepared))
    assert out2.shape == (300,)
    assert jnp.allclose(out2, ref(x2, z2, params), atol=5e-2, rtol=5e-2)

    print("KERNEL_OK")
</pallas_src>

<mosaic_0001>
module attributes {stable_mosaic.version = 11 : i64} {
  func.func @_discriminator_kernel(%arg0: i32, %arg1: memref<8x4xf32, #tpu.memory_space<vmem>>, %arg2: memref<4x1024xf32, #tpu.memory_space<vmem>>, %arg3: memref<1x1024xf32, #tpu.memory_space<vmem>>, %arg4: memref<1024x512xbf16, #tpu.memory_space<vmem>>, %arg5: memref<1x512xf32, #tpu.memory_space<vmem>>, %arg6: memref<512x128xbf16, #tpu.memory_space<vmem>>, %arg7: memref<1x128xf32, #tpu.memory_space<vmem>>, %arg8: memref<1x128xf32, #tpu.memory_space<vmem>>, %arg9: memref<1x1xf32, #tpu.memory_space<vmem>>, %arg10: memref<8x1xf32, #tpu.memory_space<vmem>>) attributes {dimension_semantics = [#tpu.dimension_semantics<parallel>], iteration_bounds = array<i64: 1>, scalar_prefetch = 0 : i64, scratch_operands = 0 : i64, tpu.core_type = #tpu.core_type<tc>, window_params = [{transform_indices = @transform_0, window_bounds = array<i64: 8, 4>}, {pipeline_mode = #tpu.pipeline_mode<synchronous>, transform_indices = @transform_1, window_bounds = array<i64: 4, 1024>}, {pipeline_mode = #tpu.pipeline_mode<synchronous>, transform_indices = @transform_2, window_bounds = array<i64: 1, 1024>}, {pipeline_mode = #tpu.pipeline_mode<synchronous>, transform_indices = @transform_3, window_bounds = array<i64: 1024, 512>}, {pipeline_mode = #tpu.pipeline_mode<synchronous>, transform_indices = @transform_4, window_bounds = array<i64: 1, 512>}, {pipeline_mode = #tpu.pipeline_mode<synchronous>, transform_indices = @transform_5, window_bounds = array<i64: 512, 128>}, {pipeline_mode = #tpu.pipeline_mode<synchronous>, transform_indices = @transform_6, window_bounds = array<i64: 1, 128>}, {pipeline_mode = #tpu.pipeline_mode<synchronous>, transform_indices = @transform_7, window_bounds = array<i64: 1, 128>}, {pipeline_mode = #tpu.pipeline_mode<synchronous>, transform_indices = @transform_8, window_bounds = array<i64: 1, 1>}, {transform_indices = @transform_9, window_bounds = array<i64: 8, 1>}]} {
    %c0 = arith.constant 0 : index
    %c0_0 = arith.constant 0 : index
    %0 = vector.load %arg1[%c0, %c0_0] : memref<8x4xf32, #tpu.memory_space<vmem>>, vector<8x4xf32>
    %c0_1 = arith.constant 0 : index
    %c0_2 = arith.constant 0 : index
    %1 = vector.load %arg2[%c0_1, %c0_2] : memref<4x1024xf32, #tpu.memory_space<vmem>>, vector<4x1024xf32>
    %c0_3 = arith.constant 0 : index
    %c0_4 = arith.constant 0 : index
    %2 = vector.load %arg3[%c0_3, %c0_4] : memref<1x1024xf32, #tpu.memory_space<vmem>>, vector<1x1024xf32>
    %3 = vector.extract_strided_slice %0 {offsets = [0, 0], sizes = [8, 1], strides = [1, 1]} : vector<8x4xf32> to vector<8x1xf32>
    %4 = vector.extract_strided_slice %1 {offsets = [0, 0], sizes = [1, 1024], strides = [1, 1]} : vector<4x1024xf32> to vector<1x1024xf32>
    %5 = vector.broadcast %3 : vector<8x1xf32> to vector<8x1024xf32>
    %6 = vector.broadcast %4 : vector<1x1024xf32> to vector<8x1024xf32>
    %7 = arith.mulf %5, %6 : vector<8x1024xf32>
    %8 = vector.broadcast %2 : vector<1x1024xf32> to vector<8x1024xf32>
    %9 = arith.addf %8, %7 : vector<8x1024xf32>
    %10 = vector.extract_strided_slice %0 {offsets = [0, 1], sizes = [8, 1], strides = [1, 1]} : vector<8x4xf32> to vector<8x1xf32>
    %11 = vector.extract_strided_slice %1 {offsets = [1, 0], sizes = [1, 1024], strides = [1, 1]} : vector<4x1024xf32> to vector<1x1024xf32>
    %12 = vector.broadcast %10 : vector<8x1xf32> to vector<8x1024xf32>
    %13 = vector.broadcast %11 : vector<1x1024xf32> to vector<8x1024xf32>
    %14 = arith.mulf %12, %13 : vector<8x1024xf32>
    %15 = arith.addf %9, %14 : vector<8x1024xf32>
    %16 = vector.extract_strided_slice %0 {offsets = [0, 2], sizes = [8, 1], strides = [1, 1]} : vector<8x4xf32> to vector<8x1xf32>
    %17 = vector.extract_strided_slice %1 {offsets = [2, 0], sizes = [1, 1024], strides = [1, 1]} : vector<4x1024xf32> to vector<1x1024xf32>
    %18 = vector.broadcast %16 : vector<8x1xf32> to vector<8x1024xf32>
    %19 = vector.broadcast %17 : vector<1x1024xf32> to vector<8x1024xf32>
    %20 = arith.mulf %18, %19 : vector<8x1024xf32>
    %21 = arith.addf %15, %20 : vector<8x1024xf32>
    %22 = vector.extract_strided_slice %0 {offsets = [0, 3], sizes = [8, 1], strides = [1, 1]} : vector<8x4xf32> to vector<8x1xf32>
    %23 = vector.extract_strided_slice %1 {offsets = [3, 0], sizes = [1, 1024], strides = [1, 1]} : vector<4x1024xf32> to vector<1x1024xf32>
    %24 = vector.broadcast %22 : vector<8x1xf32> to vector<8x1024xf32>
    %25 = vector.broadcast %23 : vector<1x1024xf32> to vector<8x1024xf32>
    %26 = arith.mulf %24, %25 : vector<8x1024xf32>
    %27 = arith.addf %21, %26 : vector<8x1024xf32>
    %cst = arith.constant 0.000000e+00 : f32
    %28 = vector.broadcast %cst : f32 to vector<8x1024xf32>
    %29 = arith.maximumf %27, %28 : vector<8x1024xf32>
    %30 = arith.truncf %29 : vector<8x1024xf32> to vector<8x1024xbf16>
    %c0_5 = arith.constant 0 : index
    %c0_6 = arith.constant 0 : index
    %31 = vector.load %arg4[%c0_5, %c0_6] : memref<1024x512xbf16, #tpu.memory_space<vmem>>, vector<1024x512xbf16>
    %cst_7 = arith.constant dense<0.000000e+00> : vector<8x512xf32>
    %32 = tpu.matmul %30, %31, %cst_7 {dimension_numbers = #tpu.dot_dimension_numbers<[1], [0], [0], [1], [0, 0, 1, 1], [], []>} : vector<8x1024xbf16>, vector<1024x512xbf16>, vector<8x512xf32> -> vector<8x512xf32>
    %c0_8 = arith.constant 0 : index
    %c0_9 = arith.constant 0 : index
    %33 = vector.load %arg5[%c0_8, %c0_9] : memref<1x512xf32, #tpu.memory_space<vmem>>, vector<1x512xf32>
    %34 = vector.broadcast %33 : vector<1x512xf32> to vector<8x512xf32>
    %35 = arith.addf %32, %34 : vector<8x512xf32>
    %cst_10 = arith.constant 0.000000e+00 : f32
    %36 = vector.broadcast %cst_10 : f32 to vector<8x512xf32>
    %37 = arith.maximumf %35, %36 : vector<8x512xf32>
    %38 = arith.truncf %37 : vector<8x512xf32> to vector<8x512xbf16>
    %c0_11 = arith.constant 0 : index
    %c0_12 = arith.constant 0 : index
    %39 = vector.load %arg6[%c0_11, %c0_12] : memref<512x128xbf16, #tpu.memory_space<vmem>>, vector<512x128xbf16>
    %cst_13 = arith.constant dense<0.000000e+00> : vector<8x128xf32>
    %40 = tpu.matmul %38, %39, %cst_13 {dimension_numbers = #tpu.dot_dimension_numbers<[1], [0], [0], [1], [0, 0, 1, 1], [], []>} : vector<8x512xbf16>, vector<512x128xbf16>, vector<8x128xf32> -> vector<8x128xf32>
    %c0_14 = arith.constant 0 : index
    %c0_15 = arith.constant 0 : index
    %41 = vector.load %arg7[%c0_14, %c0_15] : memref<1x128xf32, #tpu.memory_space<vmem>>, vector<1x128xf32>
    %42 = vector.broadcast %41 : vector<1x128xf32> to vector<8x128xf32>
    %43 = arith.addf %40, %42 : vector<8x128xf32>
    %cst_16 = arith.constant 0.000000e+00 : f32
    %44 = vector.broadcast %cst_16 : f32 to vector<8x128xf32>
    %45 = arith.maximumf %43, %44 : vector<8x128xf32>
    %c0_17 = arith.constant 0 : index
    %c0_18 = arith.constant 0 : index
    %46 = vector.load %arg8[%c0_17, %c0_18] : memref<1x128xf32, #tpu.memory_space<vmem>>, vector<1x128xf32>
    %47 = vector.broadcast %46 : vector<1x128xf32> to vector<8x128xf32>
    %48 = arith.mulf %45, %47 : vector<8x128xf32>
    %cst_19 = arith.constant dense<0.000000e+00> : vector<8xf32>
    %49 = vector.multi_reduction <add>, %48, %cst_19 [1] : vector<8x128xf32> to vector<8xf32>
    %50 = vector.shape_cast %49 : vector<8xf32> to vector<8x1xf32>
    %c0_20 = arith.constant 0 : index
    %c0_21 = arith.constant 0 : index
    %51 = vector.load %arg9[%c0_20, %c0_21] : memref<1x1xf32, #tpu.memory_space<vmem>>, vector<1x1xf32>
    %52 = vector.broadcast %51 : vector<1x1xf32> to vector<8x1xf32>
    %53 = arith.addf %50, %52 : vector<8x1xf32>
    %c0_22 = arith.constant 0 : index
    %c0_23 = arith.constant 0 : index
    %54 = vector.load %arg10[%c0_22, %c0_23] : memref<8x1xf32, #tpu.memory_space<vmem>>, vector<8x1xf32>
    tpu.vector_store %arg10[%c0_22, %c0_23], %53 {strides = array<i32>} : memref<8x1xf32, #tpu.memory_space<vmem>>, vector<8x1xf32>,
    return
  }
  func.func @transform_0(%arg0: i32) -> (i32, i32) {
    %c0_i32 = arith.constant 0 : i32
    %c0_i32_0 = arith.constant 0 : i32
    return %arg0, %c0_i32 : i32, i32
  }
  func.func @transform_1(%arg0: i32) -> (i32, i32) {
    %c0_i32 = arith.constant 0 : i32
    %c0_i32_0 = arith.constant 0 : i32
    %c0_i32_1 = arith.constant 0 : i32
    return %c0_i32, %c0_i32_0 : i32, i32
  }
  func.func @transform_2(%arg0: i32) -> (i32, i32) {
    %c0_i32 = arith.constant 0 : i32
    %c0_i32_0 = arith.constant 0 : i32
    %c0_i32_1 = arith.constant 0 : i32
    return %c0_i32, %c0_i32_0 : i32, i32
  }
  func.func @transform_3(%arg0: i32) -> (i32, i32) {
    %c0_i32 = arith.constant 0 : i32
    %c0_i32_0 = arith.constant 0 : i32
    %c0_i32_1 = arith.constant 0 : i32
    return %c0_i32, %c0_i32_0 : i32, i32
  }
  func.func @transform_4(%arg0: i32) -> (i32, i32) {
    %c0_i32 = arith.constant 0 : i32
    %c0_i32_0 = arith.constant 0 : i32
    %c0_i32_1 = arith.constant 0 : i32
    return %c0_i32, %c0_i32_0 : i32, i32
  }
  func.func @transform_5(%arg0: i32) -> (i32, i32) {
    %c0_i32 = arith.constant 0 : i32
    %c0_i32_0 = arith.constant 0 : i32
    %c0_i32_1 = arith.constant 0 : i32
    return %c0_i32, %c0_i32_0 : i32, i32
  }
  func.func @transform_6(%arg0: i32) -> (i32, i32) {
    %c0_i32 = arith.constant 0 : i32
    %c0_i32_0 = arith.constant 0 : i32
    %c0_i32_1 = arith.constant 0 : i32
    return %c0_i32, %c0_i32_0 : i32, i32
  }
  func.func @transform_7(%arg0: i32) -> (i32, i32) {
    %c0_i32 = arith.constant 0 : i32
    %c0_i32_0 = arith.constant 0 : i32
    %c0_i32_1 = arith.constant 0 : i32
    return %c0_i32, %c0_i32_0 : i32, i32
  }
  func.func @transform_8(%arg0: i32) -> (i32, i32) {
    %c0_i32 = arith.constant 0 : i32
    %c0_i32_0 = arith.constant 0 : i32
    %c0_i32_1 = arith.constant 0 : i32
    return %c0_i32, %c0_i32_0 : i32, i32
  }
  func.func @transform_9(%arg0: i32) -> (i32, i32) {
    %c0_i32 = arith.constant 0 : i32
    %c0_i32_0 = arith.constant 0 : i32
    return %arg0, %c0_i32 : i32, i32
  }
}

</mosaic_0001>

<bundles_post_ra>
// kernel: tpu_custom_call.1
= control target key start
LH: loop header
LB: loop body
LE: loop exit
PB: predicated region body
PF: predicated region fallthrough
CT: control target
= control target key end

     0   :  { %s4483_s0 = inlined_call_operand.vmem [shape: f32[8,4], index: 0, kind: input, shape index: {}]   ;;  %s4484_s1 = inlined_call_operand.hbm [shape: f32[4,1024], index: 1, kind: input, shape index: {}]   ;;  %s4485_s2 = inlined_call_operand.vmem [shape: f32[1,1024], index: 2, kind: input, shape index: {}]   ;;  %s4486_s3 = inlined_call_operand.hbm [shape: bf16[1024,512], index: 3, kind: input, shape index: {}]   ;;  %s4487_s4 = inlined_call_operand.vmem [shape: f32[1,512], index: 4, kind: input, shape index: {}]   ;;  %s4488_s5 = inlined_call_operand.hbm [shape: bf16[512,128], index: 5, kind: input, shape index: {}]   ;;  %s4489_s6 = inlined_call_operand.vmem [shape: f32[1,128], index: 6, kind: input, shape index: {}]   ;;  %s4490_s7 = inlined_call_operand.vmem [shape: f32[1,128], index: 7, kind: input, shape index: {}]   ;;  %s4491_s8 = inlined_call_operand.<no memory space> [shape: f32[1,1], index: 8, kind: input, shape index: {}]   ;;  %s4492_s9 = inlined_call_operand.vmem [shape: f32[8,1], index: 9, kind: output, shape index: {}]  }
   0x1   :  { %v14_v0 = vstv %s4491_s8 }
   0x2   :  { %15 = vst [vmem:[#allocation2] sm:$0x1] %v14_v0 }
   0x3   :  { %16 = vsyncpa [#allocation4], 0 }
   0x4   :  { %17 = vsyncpa [#allocation6], 0  ;;  %s37_s13 = sshll.u32 %s4486_s3, 4  ;;  %s4137_s14 = smov [#allocation5]   ;;  %s38_s13 = int_to_ptr.hbm [resolvable:$true] %s37_s13 }
   0x5   :  { %s39_s15 = sshll.u32 %s4137_s14, 4  ;;  %s25_s18 = sshll.u32 %s4484_s1, 4  ;;  %s40_s15 = int_to_ptr.vmem [resolvable:$true] %s39_s15  ;;  %s26_s18 = int_to_ptr.hbm [resolvable:$true] %s25_s18 }
   0x6   :  { %s4138_s19 = smov 256   ;;  %s4139_s20 = smov 16  }
   0x7   :  { %45 = dma.hbm_to_vmem [thread:$0]  %s38_s13, 32768, %s40_s15, [#allocation6], %s4138_s19, %s4138_s19, %s4139_s20  }
   0x8   :  { %s4140_s8 = smov [#allocation3]   ;;  %s52_s24 = sshll.u32 %s4488_s5, 4  ;;  %s53_s24 = int_to_ptr.hbm [resolvable:$true] %s52_s24 }
   0x9   :  { %s27_s21 = sshll.u32 %s4140_s8, 4  ;;  %s4141_s3 = smov [#allocation7]   ;;  %s28_s21 = int_to_ptr.vmem [resolvable:$true] %s27_s21 }
   0xa   :  { %30 = dma.hbm_to_vmem [thread:$0]  %s26_s18, 512, %s28_s21, [#allocation4]  }
   0xb   :  { %s54_s25 = sshll.u32 %s4141_s3, 4  ;;  %s4142_s26 = smov 64   ;;  %s55_s25 = int_to_ptr.vmem [resolvable:$true] %s54_s25 }
   0xc   :  { %s4143_s27 = smov 4  }
   0xd   :  { %60 = dma.hbm_to_vmem [thread:$0]  %s53_s24, 4096, %s55_s25, [#allocation6], %s4142_s26, %s4142_s26, %s4143_s27  }
   0xe   :  { %4133 = dma.done.wait [#allocation4], 512  }
   0xf   :  { %4134 = vsyncadd [#allocation4], 4294966784 }
  0x10   :  { %4135 = dma.done.wait [#allocation6], 36864  }
  0x11   :  { %4136 = vsyncadd [#allocation6], 4294930432  ;;  %v4144_v1 = vmov 0   ;;  %v4145_v2 = vmov 2   ;;  %v79_v3 = vld [vmem:[%s4483_s0] sm:$0xff]  ;;  %v4146_v39 = vmov 1  }
  0x12   :  { %4053 = vset.pattern.permute.xlu0 %v4144_v1  ;;  %4055 = vset.pattern.permute.xlu1 %v4145_v2  ;;  %v2716_v4 = vld [vmem:[#allocation5 + $0xe0] sm:$0xf]  ;;  %v3784_v5 = vld [vmem:[#allocation5 + $0xec] sm:$0xf0]  ;;  %v4147_v40 = vmov 3   ;;  %vm2594_vm0 = vcmask 7168  }
  0x13   :  { %87 = vperm.xlu0 %4053, %v79_v3   ;;  %196 = vperm.xlu1 %4055, %v79_v3   ;;  %v2717_v6 = vor.u32 %v3784_v5, %v2716_v4  ;;  %v2844_v7 = vld [vmem:[#allocation5 + $0x1e0] sm:$0xf]  ;;  %v3816_v8 = vld [vmem:[#allocation5 + $0x1ec] sm:$0xf0] }
  0x14   :  { %v2972_v9 = vld [vmem:[#allocation5 + $0x2e0] sm:$0xf]  ;;  %v2845_v10 = vor.u32 %v3816_v8, %v2844_v7  ;;  %v3848_v11 = vld [vmem:[#allocation5 + $0x2ec] sm:$0xf0] }
  0x15   :  { %v3100_v12 = vld [vmem:[#allocation5 + $0x3e0] sm:$0xf]  ;;  %v3880_v13 = vld [vmem:[#allocation5 + $0x3ec] sm:$0xf0]  ;;  %1845 = vmatpush.bf16.msra.mxu0 %v2717_v6  ;;  %v2973_v14 = vor.u32 %v3848_v11, %v2972_v9 }
  0x16   :  { %v3101_v15 = vor.u32 %v3880_v13, %v3100_v12  ;;  %v2700_v16 = vld [vmem:[#allocation5 + $0xc0] sm:$0xf]  ;;  %v3780_v17 = vld [vmem:[#allocation5 + $0xcc] sm:$0xf0]  ;;  %1858 = vmatpush.bf16.msra.mxu1 %v2845_v10 }
  0x17   :  { %v2828_v18 = vld [vmem:[#allocation5 + $0x1c0] sm:$0xf]  ;;  %v2701_v19 = vor.u32 %v3780_v17, %v2700_v16  ;;  %v3812_v20 = vld [vmem:[#allocation5 + $0x1cc] sm:$0xf0]  ;;  %1871 = vmatpush.bf16.msra.mxu2 %v2973_v14 }
  0x18   :  { %v2956_v21 = vld [vmem:[#allocation5 + $0x2c0] sm:$0xf]  ;;  %v3844_v22 = vld [vmem:[#allocation5 + $0x2cc] sm:$0xf0]  ;;  %1884 = vmatpush.bf16.msra.mxu3 %v3101_v15  ;;  %v2829_v23 = vor.u32 %v3812_v20, %v2828_v18 }
  0x19   :  { %v3084_v24 = vld [vmem:[#allocation5 + $0x3c0] sm:$0xf]  ;;  %v3876_v25 = vld [vmem:[#allocation5 + $0x3cc] sm:$0xf0]  ;;  %1846 = vmatpush.bf16.msra.mxu0 %v2701_v19  ;;  %v2957_v30 = vor.u32 %v3844_v22, %v2956_v21 }
  0x1a   :  { %v2684_v26 = vld [vmem:[#allocation5 + $0xa0] sm:$0xf]  ;;  %v3776_v27 = vld [vmem:[#allocation5 + $0xac] sm:$0xf0]  ;;  %v3085_v31 = vor.u32 %v3876_v25, %v3084_v24  ;;  %1859 = vmatpush.bf16.msra.mxu1 %v2829_v23 }
  0x1b   :  { %v2812_v28 = vld [vmem:[#allocation5 + $0x1a0] sm:$0xf]  ;;  %v3808_v29 = vld [vmem:[#allocation5 + $0x1ac] sm:$0xf0]  ;;  %v2685_v34 = vor.u32 %v3776_v27, %v2684_v26  ;;  %4054 = vset.pattern.permute.xlu0 %v4146_v39  ;;  %4056 = vset.pattern.permute.xlu1 %v4147_v40 }
  0x1c   :  { %v2940_v32 = vld [vmem:[#allocation5 + $0x2a0] sm:$0xf]  ;;  %v3840_v33 = vld [vmem:[#allocation5 + $0x2ac] sm:$0xf0]  ;;  %v2813_v35 = vor.u32 %v3808_v29, %v2812_v28  ;;  %152 = vperm.xlu0 %4054, %v79_v3   ;;  %240 = vperm.xlu1 %4056, %v79_v3  }
  0x1d   :  { %v3068_v36 = vld [vmem:[#allocation5 + $0x3a0] sm:$0xf]  ;;  %v3872_v37 = vld [vmem:[#allocation5 + $0x3ac] sm:$0xf0]  ;;  %1872 = vmatpush.bf16.msra.mxu2 %v2957_v30  ;;  %1885 = vmatpush.bf16.msra.mxu3 %v3085_v31  ;;  %v2941_v44 = vor.u32 %v3840_v33, %v2940_v32 }
  0x1e   :  { %v2668_v38 = vld [vmem:[#allocation5 + $0x80] sm:$0xf]  ;;  %v3772_v41 = vld [vmem:[#allocation5 + $0x8c] sm:$0xf0]  ;;  %v3069_v45 = vor.u32 %v3872_v37, %v3068_v36  ;;  %1847 = vmatpush.bf16.msra.mxu0 %v2685_v34  ;;  %1860 = vmatpush.bf16.msra.mxu1 %v2813_v35 }
  0x1f   :  { %v2796_v42 = vld [vmem:[#allocation5 + $0x180] sm:$0xf]  ;;  %v3804_v43 = vld [vmem:[#allocation5 + $0x18c] sm:$0xf0]  ;;  %v2669_v48 = vor.u32 %v3772_v41, %v2668_v38 }
  0x20   :  { %v2924_v46 = vld [vmem:[#allocation5 + $0x280] sm:$0xf]  ;;  %v3836_v47 = vld [vmem:[#allocation5 + $0x28c] sm:$0xf0]  ;;  %v2797_v49 = vor.u32 %v3804_v43, %v2796_v42 }
  0x21   :  { %v3052_v50 = vld [vmem:[#allocation5 + $0x380] sm:$0xf]  ;;  %v3868_v51 = vld [vmem:[#allocation5 + $0x38c] sm:$0xf0]  ;;  %1873 = vmatpush.bf16.msra.mxu2 %v2941_v44  ;;  %1886 = vmatpush.bf16.msra.mxu3 %v3069_v45  ;;  %v2925_v56 = vor.u32 %v3836_v47, %v2924_v46 }
  0x22   :  { %v2652_v52 = vld [vmem:[#allocation5 + $0x60] sm:$0xf]  ;;  %v3768_v53 = vld [vmem:[#allocation5 + $0x6c] sm:$0xf0]  ;;  %v3053_v57 = vor.u32 %v3868_v51, %v3052_v50  ;;  %1848 = vmatpush.bf16.msra.mxu0 %v2669_v48  ;;  %1861 = vmatpush.bf16.msra.mxu1 %v2797_v49 }
  0x23   :  { %v2780_v54 = vld [vmem:[#allocation5 + $0x160] sm:$0xf]  ;;  %v3800_v55 = vld [vmem:[#allocation5 + $0x16c] sm:$0xf0]  ;;  %v2653_v60 = vor.u32 %v3768_v53, %v2652_v52 }
  0x24   :  { %v2908_v58 = vld [vmem:[#allocation5 + $0x260] sm:$0xf]  ;;  %v3832_v59 = vld [vmem:[#allocation5 + $0x26c] sm:$0xf0]  ;;  %v2781_v61 = vor.u32 %v3800_v55, %v2780_v54  ;;  %4057 = vset.pattern.permute.xlu0 %v4147_v40 }
  0x25   :  { %v3036_v62 = vld [vmem:[#allocation5 + $0x360] sm:$0xf]  ;;  %v3864_v63 = vld [vmem:[#allocation5 + $0x36c] sm:$0xf0]  ;;  %1874 = vmatpush.bf16.msra.mxu2 %v2925_v56  ;;  %1887 = vmatpush.bf16.msra.mxu3 %v3053_v57  ;;  %v2909_v4 = vor.u32 %v3832_v59, %v2908_v58 }
  0x26   :  { %v2636_v0 = vld [vmem:[#allocation5 + $0x40] sm:$0xf]  ;;  %v3764_v1 = vld [vmem:[#allocation5 + $0x4c] sm:$0xf0]  ;;  %v3037_v5 = vor.u32 %v3864_v63, %v3036_v62  ;;  %1849 = vmatpush.bf16.msra.mxu0 %v2653_v60  ;;  %1862 = vmatpush.bf16.msra.mxu1 %v2781_v61 }
  0x27   :  { %v2764_v2 = vld [vmem:[#allocation5 + $0x140] sm:$0xf]  ;;  %v3796_v3 = vld [vmem:[#allocation5 + $0x14c] sm:$0xf0]  ;;  %v2637_v8 = vor.u32 %v3764_v1, %v2636_v0 }
  0x28   :  { %v2892_v6 = vld [vmem:[#allocation5 + $0x240] sm:$0xf]  ;;  %v3828_v7 = vld [vmem:[#allocation5 + $0x24c] sm:$0xf0]  ;;  %v2765_v9 = vor.u32 %v3796_v3, %v2764_v2 }
  0x29   :  { %v3020_v10 = vld [vmem:[#allocation5 + $0x340] sm:$0xf]  ;;  %v3860_v11 = vld [vmem:[#allocation5 + $0x34c] sm:$0xf0]  ;;  %1875 = vmatpush.bf16.msra.mxu2 %v2909_v4  ;;  %1888 = vmatpush.bf16.msra.mxu3 %v3037_v5  ;;  %v2893_v16 = vor.u32 %v3828_v7, %v2892_v6 }
  0x2a   :  { %v2620_v12 = vld [vmem:[#allocation5 + $0x20] sm:$0xf]  ;;  %v3760_v13 = vld [vmem:[#allocation5 + $0x2c] sm:$0xf0]  ;;  %v3021_v17 = vor.u32 %v3860_v11, %v3020_v10  ;;  %1850 = vmatpush.bf16.msra.mxu0 %v2637_v8  ;;  %1863 = vmatpush.bf16.msra.mxu1 %v2765_v9 }
  0x2b   :  { %v2748_v14 = vld [vmem:[#allocation5 + $0x120] sm:$0xf]  ;;  %v3792_v15 = vld [vmem:[#allocation5 + $0x12c] sm:$0xf0]  ;;  %v2621_v21 = vor.u32 %v3760_v13, %v2620_v12 }
  0x2c   :  { %v2876_v18 = vld [vmem:[#allocation5 + $0x220] sm:$0xf]  ;;  %v3824_v19 = vld [vmem:[#allocation5 + $0x22c] sm:$0xf0]  ;;  %v2749_v22 = vor.u32 %v3792_v15, %v2748_v14 }
  0x2d   :  { %v3004_v20 = vld [vmem:[#allocation5 + $0x320] sm:$0xf]  ;;  %v3856_v23 = vld [vmem:[#allocation5 + $0x32c] sm:$0xf0]  ;;  %1876 = vmatpush.bf16.msra.mxu2 %v2893_v16  ;;  %1889 = vmatpush.bf16.msra.mxu3 %v3021_v17  ;;  %v2877_v35 = vor.u32 %v3824_v19, %v2876_v18 }
  0x2e   :  { %v2604_v24 = vld [vmem:[#allocation5] sm:$0xf]  ;;  %v3756_v25 = vld [vmem:[#allocation5 + $0xc] sm:$0xf0]  ;;  %v3005_v36 = vor.u32 %v3856_v23, %v3004_v20  ;;  %1851 = vmatpush.bf16.msra.mxu0 %v2621_v21  ;;  %1864 = vmatpush.bf16.msra.mxu1 %v2749_v22 }
  0x2f   :  { %v2732_v26 = vld [vmem:[#allocation5 + $0x100] sm:$0xf]  ;;  %v3788_v27 = vld [vmem:[#allocation5 + $0x10c] sm:$0xf0]  ;;  %v2605_v37 = vor.u32 %v3756_v25, %v2604_v24 }
  0x30   :  { %v3228_v28 = vld [vmem:[#allocation5 + $0x4e0] sm:$0xf]  ;;  %v3820_v30 = vld [vmem:[#allocation5 + $0x20c] sm:$0xf0]  ;;  %v2733_v38 = vor.u32 %v3788_v27, %v2732_v26 }
  0x31   :  { %v2860_v29 = vld [vmem:[#allocation5 + $0x200] sm:$0xf]  ;;  %v3912_v32 = vld [vmem:[#allocation5 + $0x4ec] sm:$0xf0]  ;;  %1877 = vmatpush.bf16.msra.mxu2 %v2877_v35  ;;  %1890 = vmatpush.bf16.msra.mxu3 %v3005_v36 }
  0x32   :  { %v2988_v31 = vld [vmem:[#allocation5 + $0x300] sm:$0xf]  ;;  %v3944_v34 = vld [vmem:[#allocation5 + $0x5ec] sm:$0xf0]  ;;  %v3229_v42 = vor.u32 %v3912_v32, %v3228_v28  ;;  %v2861_v50 = vor.u32 %v3820_v30, %v2860_v29  ;;  %1852 = vmatpush.bf16.msra.mxu0 %v2605_v37  ;;  %1865 = vmatpush.bf16.msra.mxu1 %v2733_v38 }
  0x33   :  { %v3356_v33 = vld [vmem:[#allocation5 + $0x5e0] sm:$0xf]  ;;  %v3852_v39 = vld [vmem:[#allocation5 + $0x30c] sm:$0xf0] }
  0x34   :  { %v3484_v40 = vld [vmem:[#allocation5 + $0x6e0] sm:$0xf]  ;;  %v3976_v41 = vld [vmem:[#allocation5 + $0x6ec] sm:$0xf0]  ;;  %v3357_v43 = vor.u32 %v3944_v34, %v3356_v33  ;;  %v2989_v51 = vor.u32 %v3852_v39, %v2988_v31 }
  0x35   :  { %v3612_v44 = vld [vmem:[#allocation5 + $0x7e0] sm:$0xf]  ;;  %v4008_v45 = vld [vmem:[#allocation5 + $0x7ec] sm:$0xf0]  ;;  %v3485_v52 = vor.u32 %v3976_v41, %v3484_v40  ;;  %1878 = vmatpush.bf16.msra.mxu2 %v2861_v50 }
  0x36   :  { %v3212_v46 = vld [vmem:[#allocation5 + $0x4c0] sm:$0xf]  ;;  %v3908_v47 = vld [vmem:[#allocation5 + $0x4cc] sm:$0xf0]  ;;  %v3613_v53 = vor.u32 %v4008_v45, %v3612_v44  ;;  %1897 = vmatpush.bf16.msrb.mxu0 %v3229_v42  ;;  %1910 = vmatpush.bf16.msrb.mxu1 %v3357_v43 }
  0x37   :  { %v3340_v48 = vld [vmem:[#allocation5 + $0x5c0] sm:$0xf]  ;;  %v3940_v49 = vld [vmem:[#allocation5 + $0x5cc] sm:$0xf0]  ;;  %v3213_v55 = vor.u32 %v3908_v47, %v3212_v46  ;;  %1891 = vmatpush.bf16.msra.mxu3 %v2989_v51 }
  0x38   :  { %v3468_v54 = vld [vmem:[#allocation5 + $0x6c0] sm:$0xf]  ;;  %v3341_v56 = vor.u32 %v3940_v49, %v3340_v48  ;;  %v3972_v57 = vld [vmem:[#allocation5 + $0x6cc] sm:$0xf0] }
  0x39   :  { %v3596_v58 = vld [vmem:[#allocation5 + $0x7c0] sm:$0xf]  ;;  %v4004_v59 = vld [vmem:[#allocation5 + $0x7cc] sm:$0xf0]  ;;  %1923 = vmatpush.bf16.msrb.mxu2 %v3485_v52  ;;  %v3469_v60 = vor.u32 %v3972_v57, %v3468_v54 }
  0x3a   :  { %v3597_v61 = vor.u32 %v4004_v59, %v3596_v58  ;;  %1898 = vmatpush.bf16.msrb.mxu0 %v3213_v55  ;;  %1911 = vmatpush.bf16.msrb.mxu1 %v3341_v56  ;;  %v3196_v62 = vld [vmem:[#allocation5 + $0x4a0] sm:$0xf]  ;;  %v3904_v63 = vld [vmem:[#allocation5 + $0x4ac] sm:$0xf0] }
  0x3b   :  { %1936 = vmatpush.bf16.msrb.mxu3 %v3613_v53  ;;  %v3324_v0 = vld [vmem:[#allocation5 + $0x5a0] sm:$0xf]  ;;  %v3197_v1 = vor.u32 %v3904_v63, %v3196_v62  ;;  %v3936_v2 = vld [vmem:[#allocation5 + $0x5ac] sm:$0xf0] }
  0x3c   :  { %v3452_v3 = vld [vmem:[#allocation5 + $0x6a0] sm:$0xf]  ;;  %v3968_v4 = vld [vmem:[#allocation5 + $0x6ac] sm:$0xf0]  ;;  %v3325_v5 = vor.u32 %v3936_v2, %v3324_v0 }
  0x3d   :  { %1924 = vmatpush.bf16.msrb.mxu2 %v3469_v60  ;;  %v3453_v6 = vor.u32 %v3968_v4, %v3452_v3  ;;  %v3580_v7 = vld [vmem:[#allocation5 + $0x7a0] sm:$0xf]  ;;  %v4000_v8 = vld [vmem:[#allocation5 + $0x7ac] sm:$0xf0] }
  0x3e   :  { %v3180_v9 = vld [vmem:[#allocation5 + $0x480] sm:$0xf]  ;;  %1899 = vmatpush.bf16.msrb.mxu0 %v3197_v1  ;;  %v3581_v10 = vor.u32 %v4000_v8, %v3580_v7  ;;  %v3900_v11 = vld [vmem:[#allocation5 + $0x48c] sm:$0xf0]  ;;  %1912 = vmatpush.bf16.msrb.mxu1 %v3325_v5  ;;  %v4213_v5 = vld [vmem:[#allocation3 + $0x8] sm:$0xff] }
  0x3f   :  { %1937 = vmatpush.bf16.msrb.mxu3 %v3597_v61  ;;  %v3308_v12 = vld [vmem:[#allocation5 + $0x580] sm:$0xf]  ;;  %v3932_v13 = vld [vmem:[#allocation5 + $0x58c] sm:$0xf0]  ;;  %v3181_v14 = vor.u32 %v3900_v11, %v3180_v9 }
  0x40   :  { %v3309_v15 = vor.u32 %v3932_v13, %v3308_v12  ;;  %v3436_v16 = vld [vmem:[#allocation5 + $0x680] sm:$0xf]  ;;  %v3964_v17 = vld [vmem:[#allocation5 + $0x68c] sm:$0xf0]  ;;  %v96_v12 = vperm.slane %v4213_v5, 0 }
  0x41   :  { %1925 = vmatpush.bf16.msrb.mxu2 %v3453_v6  ;;  %v3564_v18 = vld [vmem:[#allocation5 + $0x780] sm:$0xf]  ;;  %v3437_v19 = vor.u32 %v3964_v17, %v3436_v16  ;;  %v3996_v20 = vld [vmem:[#allocation5 + $0x78c] sm:$0xf0] }
  0x42   :  { %v3164_v21 = vld [vmem:[#allocation5 + $0x460] sm:$0xf]  ;;  %v3896_v22 = vld [vmem:[#allocation5 + $0x46c] sm:$0xf0]  ;;  %v3565_v23 = vor.u32 %v3996_v20, %v3564_v18  ;;  %1900 = vmatpush.bf16.msrb.mxu0 %v3181_v14  ;;  %1913 = vmatpush.bf16.msrb.mxu1 %v3309_v15 }
  0x43   :  { %1938 = vmatpush.bf16.msrb.mxu3 %v3581_v10  ;;  %v3292_v24 = vld [vmem:[#allocation5 + $0x560] sm:$0xf]  ;;  %v3928_v25 = vld [vmem:[#allocation5 + $0x56c] sm:$0xf0]  ;;  %v3165_v27 = vor.u32 %v3896_v22, %v3164_v21  ;;  %v157_v21 = vperm.slane %v4213_v5, 1  ;;  %v201_v22 = vperm.slane %v4213_v5, 2 }
  0x44   :  { %v3420_v26 = vld [vmem:[#allocation5 + $0x660] sm:$0xf]  ;;  %v3960_v28 = vld [vmem:[#allocation5 + $0x66c] sm:$0xf0]  ;;  %v3293_v31 = vor.u32 %v3928_v25, %v3292_v24  ;;  %v97_v24 = vperm.slane %v4213_v5, 4 }
  0x45   :  { %v3548_v29 = vld [vmem:[#allocation5 + $0x760] sm:$0xf]  ;;  %v3992_v30 = vld [vmem:[#allocation5 + $0x76c] sm:$0xf0]  ;;  %1926 = vmatpush.bf16.msrb.mxu2 %v3437_v19  ;;  %v3421_v32 = vor.u32 %v3960_v28, %v3420_v26  ;;  %v158_v28 = vperm.slane %v4213_v5, 5 }
  0x46   :  { %v3549_v33 = vor.u32 %v3992_v30, %v3548_v29  ;;  %1901 = vmatpush.bf16.msrb.mxu0 %v3165_v27  ;;  %v3148_v34 = vld [vmem:[#allocation5 + $0x440] sm:$0xf]  ;;  %v3892_v35 = vld [vmem:[#allocation5 + $0x44c] sm:$0xf0]  ;;  %1914 = vmatpush.bf16.msrb.mxu1 %v3293_v31  ;;  %v112_v27 = vperm.slane %v96_v12, 0 }
  0x47   :  { %1939 = vmatpush.bf16.msrb.mxu3 %v3565_v23  ;;  %v3276_v36 = vld [vmem:[#allocation5 + $0x540] sm:$0xf]  ;;  %v3149_v37 = vor.u32 %v3892_v35, %v3148_v34  ;;  %v3924_v38 = vld [vmem:[#allocation5 + $0x54c] sm:$0xf0]  ;;  %v245_v23 = vperm.slane %v4213_v5, 3 }
  0x48   :  { %v3404_v39 = vld [vmem:[#allocation5 + $0x640] sm:$0xf]  ;;  %v3956_v40 = vld [vmem:[#allocation5 + $0x64c] sm:$0xf0]  ;;  %v3277_v41 = vor.u32 %v3924_v38, %v3276_v36  ;;  %v4243_v38 = vperm.slane %v157_v21, 1  ;;  %v4306_v21 = vld [vmem:[#allocation3 + $0x18] sm:$0xff] }
  0x49   :  { %1927 = vmatpush.bf16.msrb.mxu2 %v3421_v32  ;;  %v3405_v42 = vor.u32 %v3956_v40, %v3404_v39  ;;  %v3532_v43 = vld [vmem:[#allocation5 + $0x740] sm:$0xf]  ;;  %v3988_v44 = vld [vmem:[#allocation5 + $0x74c] sm:$0xf0]  ;;  %v202_v32 = vperm.slane %v4213_v5, 6  ;;  %v217_v39 = vperm.slane %v201_v22, 2 }
  0x4a   :  { %v3132_v45 = vld [vmem:[#allocation5 + $0x420] sm:$0xf]  ;;  %v3533_v46 = vor.u32 %v3988_v44, %v3532_v43  ;;  %v3888_v47 = vld [vmem:[#allocation5 + $0x42c] sm:$0xf0]  ;;  %1902 = vmatpush.bf16.msrb.mxu0 %v3149_v37  ;;  %1915 = vmatpush.bf16.msrb.mxu1 %v3277_v41  ;;  %v4245_v40 = vperm.slane %v245_v23, 3  ;;  %v113_v41 = vperm.slane %v97_v24, 0 }
  0x4b   :  { %1940 = vmatpush.bf16.msrb.mxu3 %v3549_v33  ;;  %v3260_v48 = vld [vmem:[#allocation5 + $0x520] sm:$0xf]  ;;  %v3920_v49 = vld [vmem:[#allocation5 + $0x52c] sm:$0xf0]  ;;  %v3133_v51 = vor.u32 %v3888_v47, %v3132_v45  ;;  %v4249_v43 = vld [vmem:[#allocation5 + $0xf0] sm:$0xf0] }
  0x4c   :  { %v80_v50 = vld [vmem:[#allocation3] sm:$0xff]  ;;  %v3952_v53 = vld [vmem:[#allocation5 + $0x62c] sm:$0xf0]  ;;  %v3261_v55 = vor.u32 %v3920_v49, %v3260_v48  ;;  %v4251_v44 = vperm.slane %v158_v28, 1  ;;  %v246_v45 = vperm.slane %v4213_v5, 7  ;;  %v218_v48 = vperm.slane %v202_v32, 2 }
  0x4d   :  { %v3388_v52 = vld [vmem:[#allocation5 + $0x620] sm:$0xf]  ;;  %1928 = vmatpush.bf16.msrb.mxu2 %v3405_v42  ;;  %v3984_v57 = vld [vmem:[#allocation5 + $0x72c] sm:$0xf0]  ;;  %v94_v4 = vperm.slane %v80_v50, 0  ;;  %v95_v8 = vperm.slane %v80_v50, 4 }
  0x4e   :  { %v3516_v54 = vld [vmem:[#allocation5 + $0x720] sm:$0xf]  ;;  %v3389_v56 = vor.u32 %v3952_v53, %v3388_v52  ;;  %v3884_v59 = vld [vmem:[#allocation5 + $0x40c] sm:$0xf0]  ;;  %1903 = vmatpush.bf16.msrb.mxu0 %v3133_v51  ;;  %1916 = vmatpush.bf16.msrb.mxu1 %v3261_v55  ;;  %v155_v11 = vperm.slane %v80_v50, 1  ;;  %v199_v14 = vperm.slane %v80_v50, 2 }
  0x4f   :  { %v3116_v58 = vld [vmem:[#allocation5 + $0x400] sm:$0xf]  ;;  %1941 = vmatpush.bf16.msrb.mxu3 %v3533_v46  ;;  %v3517_v60 = vor.u32 %v3984_v57, %v3516_v54  ;;  %v3916_v62 = vld [vmem:[#allocation5 + $0x50c] sm:$0xf0]  ;;  %v4221_v13 = vperm.slane %v94_v4, 0  ;;  %v156_v15 = vperm.slane %v80_v50, 5 }
  0x50   :  { %v3244_v61 = vld [vmem:[#allocation5 + $0x500] sm:$0xf]  ;;  %v3948_v0 = vld [vmem:[#allocation5 + $0x60c] sm:$0xf0]  ;;  %v3117_v3 = vor.u32 %v3884_v59, %v3116_v58  ;;  %v200_v16 = vperm.slane %v80_v50, 6  ;;  %v243_v18 = vperm.slane %v80_v50, 3 }
  0x51   :  { %v3372_v63 = vld [vmem:[#allocation5 + $0x600] sm:$0xf]  ;;  %v3980_v2 = vld [vmem:[#allocation5 + $0x70c] sm:$0xf0]  ;;  %1929 = vmatpush.bf16.msrb.mxu2 %v3389_v56  ;;  %v3245_v6 = vor.u32 %v3916_v62, %v3244_v61  ;;  %v111_v19 = vperm.slane %v95_v8, 0  ;;  %v244_v20 = vperm.slane %v80_v50, 7 }
  0x52   :  { %v3500_v1 = vld [vmem:[#allocation5 + $0x700] sm:$0xf]  ;;  %v3373_v7 = vor.u32 %v3948_v0, %v3372_v63  ;;  %1904 = vmatpush.bf16.msrb.mxu0 %v3117_v3  ;;  %v4228_v25 = vperm.slane %v155_v11, 1  ;;  %v215_v29 = vperm.slane %v199_v14, 2  ;;  %v4232_v30 = vperm.slane %v156_v15, 1  ;;  %v4241_v37 = vld [vmem:[#allocation3 + $0x10] sm:$0xff] }
  0x53   :  { %1942 = vmatpush.bf16.msrb.mxu3 %v3517_v60  ;;  %v3501_v9 = vor.u32 %v3980_v2, %v3500_v1  ;;  %v4218_v10 = vld [vmem:[%s4485_s2] sm:$0xff]  ;;  %1917 = vmatpush.bf16.msrb.mxu1 %v3245_v6  ;;  %v216_v31 = vperm.slane %v200_v16, 2  ;;  %v4235_v33 = vperm.slane %v243_v18, 3  ;;  %v4237_v34 = vperm.slane %v244_v20, 3  ;;  %v4256_v47 = vld [vmem:[#allocation5 + $0x1f0] sm:$0xf0] }
  0x54   :  { %v127_v17 = vperm.slane %v4218_v10, 0  ;;  %v128_v26 = vperm.slane %v4218_v10, 1  ;;  %v129_v35 = vperm.slane %v4218_v10, 2  ;;  %v130_v36 = vperm.slane %v4218_v10, 3  ;;  %v4247_v42 = vld [vmem:[#allocation5 + $0xe4] sm:$0xf] }
  0x55   :  { %1930 = vmatpush.bf16.msrb.mxu2 %v3373_v7  ;;  %v4254_v46 = vld [vmem:[#allocation5 + $0x1e4] sm:$0xf]  ;;  %v4260_v50 = vld [vmem:[#allocation5 + $0x2f0] sm:$0xf0]  ;;  %v98_v51 = vperm.slane %v4241_v37, 0  ;;  %v2721_v60 = vor.u32 %v4247_v42, %v4249_v43  ;;  %v159_v63 = vperm.slane %v4241_v37, 1 }
  0x56   :  { %v4258_v49 = vld [vmem:[#allocation5 + $0x2e4] sm:$0xf]  ;;  %v4265_v53 = vld [vmem:[#allocation5 + $0x3f0] sm:$0xf0]  ;;  %v203_v0 = vperm.slane %v4241_v37, 2  ;;  %v262_v1 = vperm.slane %v246_v45, 3  ;;  %v2849_v2 = vor.u32 %v4254_v46, %v4256_v47 }
  0x57   :  { %1943 = vmatpush.bf16.msrb.mxu3 %v3501_v9  ;;  %v4263_v52 = vld [vmem:[#allocation5 + $0x3e4] sm:$0xf]  ;;  %v4269_v55 = vld [vmem:[#allocation5 + $0xd0] sm:$0xf0]  ;;  %v114_v3 = vperm.slane %v98_v51, 0  ;;  %v131_v4 = vperm.slane %v4218_v10, 4  ;;  %v2977_v5 = vor.u32 %v4258_v49, %v4260_v50 }
  0x58   :  { %v4267_v54 = vld [vmem:[#allocation5 + $0xc4] sm:$0xf]  ;;  %v4273_v57 = vld [vmem:[#allocation5 + $0x1d0] sm:$0xf0]  ;;  %v3105_v6 = vor.u32 %v4263_v52, %v4265_v53  ;;  %v175_v16 = vperm.slane %v159_v63, 1  ;;  %v219_v18 = vperm.slane %v203_v0, 2 }
  0x59   :  { %v4271_v56 = vld [vmem:[#allocation5 + $0x1c4] sm:$0xf]  ;;  %v4283_v62 = vld [vmem:[#allocation5 + $0x2d0] sm:$0xf0]  ;;  %v247_v20 = vperm.slane %v4241_v37, 3  ;;  %v160_v28 = vperm.slane %v4241_v37, 5  ;;  %v4493_v52 = vor.u32 %v4267_v54, %v4269_v55 }
  0x5a   :  { %v4281_v61 = vld [vmem:[#allocation5 + $0x2c4] sm:$0xf]  ;;  %v204_v32 = vperm.slane %v4241_v37, 6  ;;  %v4494_v53 = vor.u32 %v4271_v56, %v4273_v57  ;;  %v3054_v56 = vld [vmem:[#allocation5 + $0x390] sm:$0xf0] }
  0x5b   :  { %v3838_v43 = vld [vmem:[#allocation5 + $0x2a4] sm:$0xf] }
  0x5c   :  { %v3834_v54 = vld [vmem:[#allocation5 + $0x284] sm:$0xf] }
  0x85   :  { %v4275_v58 = vpop.permute.xlu0 %87  ;;  %v4277_v59 = vpop.permute.xlu1 %196 }
  0x86   :  { %v118_v9 = vmul.f32 %v4221_v13, %v4275_v58  ;;  %v119_v11 = vmul.f32 %v111_v19, %v4275_v58  ;;  %v120_v12 = vmul.f32 %v112_v27, %v4275_v58  ;;  %v121_v15 = vmul.f32 %v113_v41, %v4275_v58 }
  0x87   :  { %v223_v22 = vmul.f32 %v215_v29, %v4277_v59  ;;  %v224_v23 = vmul.f32 %v216_v31, %v4277_v59  ;;  %v122_v13 = vmul.f32 %v114_v3, %v4275_v58  ;;  %v99_v19 = vperm.slane %v4241_v37, 4 }
  0x88   :  { %v225_v24 = vmul.f32 %v217_v39, %v4277_v59  ;;  %v226_v27 = vmul.f32 %v218_v48, %v4277_v59  ;;  %v143_v41 = vadd.f32 %v127_v17, %v118_v9  ;;  %v144_v29 = vadd.f32 %v128_v26, %v119_v11 }
  0x89   :  { %v145_v45 = vadd.f32 %v129_v35, %v120_v12  ;;  %v100_v31 = vperm.slane %v4306_v21, 0  ;;  %v146_v51 = vadd.f32 %v130_v36, %v121_v15  ;;  %v4322_v63 = vmul.f32 %v219_v18, %v4277_v59 }
  0x8a   :  { %v263_v39 = vperm.slane %v247_v20, 3  ;;  %v132_v48 = vperm.slane %v4218_v10, 5  ;;  %v147_v14 = vadd.f32 %v131_v4, %v122_v13  ;;  %v115_v8 = vperm.slane %v99_v19, 0 }
  0x8b   :  { %v248_v17 = vperm.slane %v4241_v37, 7  ;;  %v133_v26 = vperm.slane %v4218_v10, 6  ;;  %v176_v9 = vperm.slane %v160_v28, 1  ;;  %v220_v11 = vperm.slane %v204_v32, 2 }
  0x8c   :  { %v116_v4 = vperm.slane %v100_v31, 0  ;;  %v161_v18 = vperm.slane %v4306_v21, 1 }
  0x8e   :  { %v4325_v0 = vpop.permute.xlu0 %152  ;;  %v4327_v3 = vpop.permute.xlu1 %240 }
  0x8f   :  { %v179_v35 = vmul.f32 %v4228_v25, %v4325_v0  ;;  %v180_v36 = vmul.f32 %v4232_v30, %v4325_v0  ;;  %v181_v12 = vmul.f32 %v4243_v38, %v4325_v0  ;;  %v182_v15 = vmul.f32 %v4251_v44, %v4325_v0 }
  0x90   :  { %v267_v20 = vmul.f32 %v4235_v33, %v4327_v3  ;;  %v268_v25 = vmul.f32 %v4237_v34, %v4327_v3  ;;  %v269_v19 = vmul.f32 %v4245_v40, %v4327_v3  ;;  %v270_v38 = vmul.f32 %v262_v1, %v4327_v3 }
  0x91   :  { %v187_v37 = vadd.f32 %v179_v35, %v143_v41  ;;  %v188_v13 = vadd.f32 %v180_v36, %v144_v29  ;;  %v189_v30 = vadd.f32 %v181_v12, %v145_v45  ;;  %v190_v28 = vadd.f32 %v182_v15, %v146_v51 }
  0x92   :  { %v183_v31 = vmul.f32 %v175_v16, %v4325_v0  ;;  %v123_v41 = vmul.f32 %v115_v8, %v4275_v58  ;;  %v264_v33 = vperm.slane %v248_v17, 3  ;;  %v205_v29 = vperm.slane %v4306_v21, 2 }
  0x93   :  { %v231_v32 = vadd.f32 %v223_v22, %v187_v37  ;;  %v232_v44 = vadd.f32 %v224_v23, %v188_v13  ;;  %v233_v35 = vadd.f32 %v225_v24, %v189_v30  ;;  %v234_v7 = vadd.f32 %v226_v27, %v190_v28 }
  0x94   :  { %v184_v45 = vmul.f32 %v176_v9, %v4325_v0  ;;  %v124_v40 = vmul.f32 %v116_v4, %v4275_v58  ;;  %v177_v1 = vperm.slane %v161_v18, 1  ;;  %v249_v22 = vperm.slane %v4306_v21, 3  ;;  %v3874_v18 = vld [vmem:[#allocation5 + $0x3c4] sm:$0xf] }
  0x95   :  { %v275_v36 = vadd.f32 %v267_v20, %v231_v32  ;;  %v276_v34 = vadd.f32 %v268_v25, %v232_v44  ;;  %v277_v51 = vadd.f32 %v269_v19, %v233_v35  ;;  %v278_v12 = vadd.f32 %v270_v38, %v234_v7  ;;  %v2686_v44 = vld [vmem:[#allocation5 + $0xb0] sm:$0xf0] }
  0x96   :  { %v191_v15 = vadd.f32 %v183_v31, %v147_v14  ;;  %v148_v8 = vadd.f32 %v132_v48, %v123_v41  ;;  %v149_v17 = vadd.f32 %v133_v26, %v124_v40  ;;  %v185_v37 = vmul.f32 %v177_v1, %v4325_v0  ;;  %v3086_v48 = vld [vmem:[#allocation5 + $0x3d0] sm:$0xf0]  ;;  %v3774_v26 = vld [vmem:[#allocation5 + $0xa4] sm:$0xf] }
  0x97   :  { %v283_v23 = vmax.f32 %v275_v36, 0.0  ;;  %v284_v16 = vmax.f32 %v276_v34, 0.0  ;;  %v285_v24 = vmax.f32 %v277_v51, 0.0  ;;  %v286_v27 = vmax.f32 %v278_v12, 0.0  ;;  %v3070_v40 = vld [vmem:[#allocation5 + $0x3b0] sm:$0xf0] }
  0x98   :  { %v192_v9 = vadd.f32 %v184_v45, %v148_v8  ;;  %v221_v4 = vperm.slane %v205_v29, 2  ;;  %v271_v30 = vmul.f32 %v263_v39, %v4327_v3  ;;  %v193_v14 = vadd.f32 %v185_v37, %v149_v17  ;;  %v3806_v39 = vld [vmem:[#allocation5 + $0x1a4] sm:$0xf]  ;;  %v2798_v8 = vld [vmem:[#allocation5 + $0x190] sm:$0xf0] }
  0x99   :  { %v4354_v20 = vpack.c.bf16 %v283_v23, %v283_v23  ;;  %v4356_v13 = vpack.c.bf16 %v284_v16, %v284_v16  ;;  %v4358_v25 = vpack.c.bf16 %v285_v24, %v285_v24  ;;  %v4360_v7 = vpack.c.bf16 %v286_v27, %v286_v27  ;;  %v3870_v45 = vld [vmem:[#allocation5 + $0x3a4] sm:$0xf]  ;;  %v2926_v24 = vld [vmem:[#allocation5 + $0x290] sm:$0xf0] }
  0x9a   :  { %v228_v19 = vmul.f32 %v220_v11, %v4277_v59  ;;  %v272_v28 = vmul.f32 %v264_v33, %v4327_v3  ;;  %v265_v38 = vperm.slane %v249_v22, 3  ;;  %v101_v32 = vperm.slane %v4306_v21, 4  ;;  %v2814_v11 = vld [vmem:[#allocation5 + $0x1b0] sm:$0xf0]  ;;  %v3866_v27 = vld [vmem:[#allocation5 + $0x384] sm:$0xf] }
  0x9b   :  { %1853 = vmatmul.bf16.vlgmr.msra.gmra.mxu0 %v4354_v20  ;;  %1866 = vmatmul.bf16.vlgmr.msra.gmra.mxu1 %v4356_v13  ;;  %v235_v31 = vadd.f32 %v4322_v63, %v191_v15  ;;  %v229_v41 = vmul.f32 %v221_v4, %v4277_v59  ;;  %v162_v35 = vperm.slane %v4306_v21, 5  ;;  %v206_v29 = vperm.slane %v4306_v21, 6  ;;  %v3802_v15 = vld [vmem:[#allocation5 + $0x184] sm:$0xf] }
  0x9c   :  { %1879 = vmatmul.bf16.vlgmr.msra.gmra.mxu2 %v4358_v25  ;;  %1892 = vmatmul.bf16.vlgmr.msra.gmra.mxu3 %v4360_v7  ;;  %v236_v33 = vadd.f32 %v228_v19, %v192_v9  ;;  %v117_v36 = vperm.slane %v101_v32, 0  ;;  %v134_v34 = vperm.slane %v4218_v10, 7  ;;  %v250_v63 = vperm.slane %v4306_v21, 7  ;;  %v2654_v19 = vld [vmem:[#allocation5 + $0x70] sm:$0xf0] }
  0x9d   :  { %1949 = vmatpush.bf16.msra.mxu0 %v2721_v60  ;;  %1962 = vmatpush.bf16.msra.mxu1 %v2849_v2  ;;  %v3089_v42 = vor.u32 %v3874_v18, %v3086_v48  ;;  %v2942_v60 = vld [vmem:[#allocation5 + $0x2b0] sm:$0xf0]  ;;  %v237_v46 = vadd.f32 %v229_v41, %v193_v14  ;;  %v273_v47 = vmul.f32 %v265_v38, %v4327_v3  ;;  %v178_v2 = vperm.slane %v162_v35, 1 }
  0x9e   :  { %1975 = vmatpush.bf16.msra.mxu2 %v2977_v5  ;;  %1988 = vmatpush.bf16.msra.mxu3 %v3105_v6  ;;  %v125_v10 = vmul.f32 %v117_v36, %v4275_v58  ;;  %v222_v21 = vperm.slane %v206_v29, 2  ;;  %v266_v51 = vperm.slane %v250_v63, 3  ;;  %v2689_v12 = vor.u32 %v3774_v26, %v2686_v44  ;;  %v3770_v5 = vld [vmem:[#allocation5 + $0x84] sm:$0xf]  ;;  %v2670_v6 = vld [vmem:[#allocation5 + $0x90] sm:$0xf0] }
  0x9f   :  { %v2817_v49 = vor.u32 %v3806_v39, %v2814_v11  ;;  %v186_v50 = vmul.f32 %v178_v2, %v4325_v0  ;;  %v279_v1 = vadd.f32 %v271_v30, %v235_v31  ;;  %v280_v22 = vadd.f32 %v272_v28, %v236_v33  ;;  %v3766_v30 = vld [vmem:[#allocation5 + $0x64] sm:$0xf]  ;;  %v2782_v32 = vld [vmem:[#allocation5 + $0x170] sm:$0xf0] }
  0xa0   :  { %v150_v23 = vadd.f32 %v134_v34, %v125_v10  ;;  %v4495_v58 = vor.u32 %v4281_v61, %v4283_v62  ;;  %v2945_v16 = vor.u32 %v3838_v43, %v2942_v60  ;;  %v3073_v0 = vor.u32 %v3870_v45, %v3070_v40  ;;  %v3798_v28 = vld [vmem:[#allocation5 + $0x164] sm:$0xf]  ;;  %v2910_v44 = vld [vmem:[#allocation5 + $0x270] sm:$0xf0] }
  0xa1   :  { %1950 = vmatpush.bf16.msra.mxu0 %v4493_v52  ;;  %1963 = vmatpush.bf16.msra.mxu1 %v4494_v53  ;;  %v281_v55 = vadd.f32 %v273_v47, %v237_v46  ;;  %v230_v17 = vmul.f32 %v222_v21, %v4277_v59  ;;  %v274_v37 = vmul.f32 %v266_v51, %v4327_v3  ;;  %v287_v62 = vmax.f32 %v279_v1, 0.0  ;;  %v3830_v59 = vld [vmem:[#allocation5 + $0x264] sm:$0xf]  ;;  %v3038_v39 = vld [vmem:[#allocation5 + $0x370] sm:$0xf0] }
  0xa2   :  { %1976 = vmatpush.bf16.msra.mxu2 %v4495_v58  ;;  %1989 = vmatpush.bf16.msra.mxu3 %v3089_v42  ;;  %v194_v57 = vadd.f32 %v186_v50, %v150_v23  ;;  %v2673_v9 = vor.u32 %v3770_v5, %v2670_v6  ;;  %v2801_v61 = vor.u32 %v3802_v15, %v2798_v8  ;;  %v288_v4 = vmax.f32 %v280_v22, 0.0  ;;  %v3862_v3 = vld [vmem:[#allocation5 + $0x364] sm:$0xf]  ;;  %v2638_v63 = vld [vmem:[#allocation5 + $0x50] sm:$0xf0] }
  0xa3   :  { %v2929_v14 = vor.u32 %v3834_v54, %v2926_v24  ;;  %v3057_v48 = vor.u32 %v3866_v27, %v3054_v56  ;;  %v289_v26 = vmax.f32 %v281_v55, 0.0  ;;  %v4402_v31 = vpack.c.bf16 %v287_v62, %v287_v62  ;;  %v3762_v34 = vld [vmem:[#allocation5 + $0x44] sm:$0xf]  ;;  %v2766_v46 = vld [vmem:[#allocation5 + $0x150] sm:$0xf0] }
  0xa4   :  { %v238_v18 = vadd.f32 %v230_v17, %v194_v57  ;;  %v4404_v41 = vpack.c.bf16 %v288_v4, %v288_v4  ;;  %v2657_v29 = vor.u32 %v3766_v30, %v2654_v19  ;;  %v2785_v33 = vor.u32 %v3798_v28, %v2782_v32  ;;  %v3794_v42 = vld [vmem:[#allocation5 + $0x144] sm:$0xf]  ;;  %v2894_v2 = vld [vmem:[#allocation5 + $0x250] sm:$0xf0] }
  0xa5   :  { %1951 = vmatpush.bf16.msra.mxu0 %v2689_v12  ;;  %1964 = vmatpush.bf16.msra.mxu1 %v2817_v49  ;;  %v4406_v11 = vpack.c.bf16 %v289_v26, %v289_v26  ;;  %v2913_v36 = vor.u32 %v3830_v59, %v2910_v44  ;;  %v3041_v60 = vor.u32 %v3862_v3, %v3038_v39  ;;  %v3826_v47 = vld [vmem:[#allocation5 + $0x244] sm:$0xf]  ;;  %v3022_v40 = vld [vmem:[#allocation5 + $0x350] sm:$0xf0] }
  0xa6   :  { %1977 = vmatpush.bf16.msra.mxu2 %v2945_v16  ;;  %1990 = vmatpush.bf16.msra.mxu3 %v3073_v0  ;;  %v282_v38 = vadd.f32 %v274_v37, %v238_v18  ;;  %v3858_v45 = vld [vmem:[#allocation5 + $0x344] sm:$0xf]  ;;  %v2641_v10 = vor.u32 %v3762_v34, %v2638_v63  ;;  %v2769_v21 = vor.u32 %v3794_v42, %v2766_v46  ;;  %v2622_v49 = vld [vmem:[#allocation5 + $0x30] sm:$0xf0] }
  0xa7   :  { %v2897_v51 = vor.u32 %v3826_v47, %v2894_v2  ;;  %v3758_v12 = vld [vmem:[#allocation5 + $0x24] sm:$0xf]  ;;  %v3025_v52 = vor.u32 %v3858_v45, %v3022_v40  ;;  %v2750_v53 = vld [vmem:[#allocation5 + $0x130] sm:$0xf0] }
  0xa8   :  { %v290_v35 = vmax.f32 %v282_v38, 0.0  ;;  %v3790_v50 = vld [vmem:[#allocation5 + $0x124] sm:$0xf]  ;;  %v2878_v6 = vld [vmem:[#allocation5 + $0x230] sm:$0xf0]  ;;  %v2625_v23 = vor.u32 %v3758_v12, %v2622_v49 }
  0xa9   :  { %1952 = vmatpush.bf16.msra.mxu0 %v2673_v9  ;;  %1965 = vmatpush.bf16.msra.mxu1 %v2801_v61  ;;  %v3822_v5 = vld [vmem:[#allocation5 + $0x224] sm:$0xf]  ;;  %v3006_v22 = vld [vmem:[#allocation5 + $0x330] sm:$0xf0]  ;;  %v2753_v0 = vor.u32 %v3790_v50, %v2750_v53 }
  0xaa   :  { %1978 = vmatpush.bf16.msra.mxu2 %v2929_v14  ;;  %1991 = vmatpush.bf16.msra.mxu3 %v3057_v48  ;;  %v4410_v43 = vpack.c.bf16 %v290_v35, %v290_v35  ;;  %v3854_v1 = vld [vmem:[#allocation5 + $0x324] sm:$0xf]  ;;  %v2606_v16 = vld [vmem:[#allocation5 + $0x10] sm:$0xf0]  ;;  %v2881_v15 = vor.u32 %v3822_v5, %v2878_v6 }
  0xab   :  { %1905 = vmatmul.bf16.vlgmr.msrb.gmra.mxu0 %v4402_v31  ;;  %1918 = vmatmul.bf16.vlgmr.msrb.gmra.mxu1 %v4404_v41  ;;  %v3754_v58 = vld [vmem:[#allocation5 + $0x4] sm:$0xf]  ;;  %v2734_v54 = vld [vmem:[#allocation5 + $0x110] sm:$0xf0]  ;;  %v3009_v24 = vor.u32 %v3854_v1, %v3006_v22 }
  0xac   :  { %1931 = vmatmul.bf16.vlgmr.msrb.gmra.mxu2 %v4406_v11  ;;  %1944 = vmatmul.bf16.vlgmr.msrb.gmra.mxu3 %v4410_v43  ;;  %v3786_v8 = vld [vmem:[#allocation5 + $0x104] sm:$0xf]  ;;  %v2862_v27 = vld [vmem:[#allocation5 + $0x210] sm:$0xf0]  ;;  %v2609_v61 = vor.u32 %v3754_v58, %v2606_v16 }
  0xad   :  { %1953 = vmatpush.bf16.msra.mxu0 %v2657_v29  ;;  %1966 = vmatpush.bf16.msra.mxu1 %v2785_v33  ;;  %v3818_v55 = vld [vmem:[#allocation5 + $0x204] sm:$0xf]  ;;  %v2990_v57 = vld [vmem:[#allocation5 + $0x310] sm:$0xf0]  ;;  %v2737_v30 = vor.u32 %v3786_v8, %v2734_v54 }
  0xae   :  { %1979 = vmatpush.bf16.msra.mxu2 %v2913_v36  ;;  %1992 = vmatpush.bf16.msra.mxu3 %v3041_v60  ;;  %v3850_v56 = vld [vmem:[#allocation5 + $0x304] sm:$0xf]  ;;  %v3230_v37 = vld [vmem:[#allocation5 + $0x4f0] sm:$0xf0]  ;;  %v2865_v14 = vor.u32 %v3818_v55, %v2862_v27 }
  0xaf   :  { %v3910_v17 = vld [vmem:[#allocation5 + $0x4e4] sm:$0xf]  ;;  %v3358_v62 = vld [vmem:[#allocation5 + $0x5f0] sm:$0xf0]  ;;  %v2993_v19 = vor.u32 %v3850_v56, %v2990_v57 }
  0xb0   :  { %v3942_v9 = vld [vmem:[#allocation5 + $0x5e4] sm:$0xf]  ;;  %v3486_v18 = vld [vmem:[#allocation5 + $0x6f0] sm:$0xf0]  ;;  %v3233_v28 = vor.u32 %v3910_v17, %v3230_v37 }
  0xb1   :  { %1954 = vmatpush.bf16.msra.mxu0 %v2641_v10  ;;  %1967 = vmatpush.bf16.msra.mxu1 %v2769_v21  ;;  %v3974_v4 = vld [vmem:[#allocation5 + $0x6e4] sm:$0xf]  ;;  %v3614_v26 = vld [vmem:[#allocation5 + $0x7f0] sm:$0xf0]  ;;  %v3361_v38 = vor.u32 %v3942_v9, %v3358_v62 }
  0xb2   :  { %1980 = vmatpush.bf16.msra.mxu2 %v2897_v51  ;;  %1993 = vmatpush.bf16.msra.mxu3 %v3025_v52  ;;  %v4006_v48 = vld [vmem:[#allocation5 + $0x7e4] sm:$0xf]  ;;  %v3489_v32 = vor.u32 %v3974_v4, %v3486_v18  ;;  %v3214_v44 = vld [vmem:[#allocation5 + $0x4d0] sm:$0xf0] }
  0xb3   :  { %v3906_v59 = vld [vmem:[#allocation5 + $0x4c4] sm:$0xf]  ;;  %v3617_v39 = vor.u32 %v4006_v48, %v3614_v26  ;;  %v3342_v35 = vld [vmem:[#allocation5 + $0x5d0] sm:$0xf0] }
  0xb4   :  { %v3938_v3 = vld [vmem:[#allocation5 + $0x5c4] sm:$0xf]  ;;  %v3470_v33 = vld [vmem:[#allocation5 + $0x6d0] sm:$0xf0]  ;;  %v3217_v63 = vor.u32 %v3906_v59, %v3214_v44 }
  0xb5   :  { %1955 = vmatpush.bf16.msra.mxu0 %v2625_v23  ;;  %1968 = vmatpush.bf16.msra.mxu1 %v2753_v0  ;;  %v3970_v29 = vld [vmem:[#allocation5 + $0x6c4] sm:$0xf]  ;;  %v3598_v34 = vld [vmem:[#allocation5 + $0x7d0] sm:$0xf0]  ;;  %v3345_v42 = vor.u32 %v3938_v3, %v3342_v35 }
  0xb6   :  { %1981 = vmatpush.bf16.msra.mxu2 %v2881_v15  ;;  %1994 = vmatpush.bf16.msra.mxu3 %v3009_v24  ;;  %v4002_v36 = vld [vmem:[#allocation5 + $0x7c4] sm:$0xf]  ;;  %v3473_v60 = vor.u32 %v3970_v29, %v3470_v33  ;;  %v3198_v47 = vld [vmem:[#allocation5 + $0x4b0] sm:$0xf0] }
  0xb7   :  { %v3902_v46 = vld [vmem:[#allocation5 + $0x4a4] sm:$0xf]  ;;  %v3601_v45 = vor.u32 %v4002_v36, %v3598_v34  ;;  %v3326_v40 = vld [vmem:[#allocation5 + $0x5b0] sm:$0xf0] }
  0xb8   :  { %v3934_v2 = vld [vmem:[#allocation5 + $0x5a4] sm:$0xf]  ;;  %v3454_v21 = vld [vmem:[#allocation5 + $0x6b0] sm:$0xf0]  ;;  %v3201_v49 = vor.u32 %v3902_v46, %v3198_v47 }
  0xb9   :  { %1956 = vmatpush.bf16.msra.mxu0 %v2609_v61  ;;  %1969 = vmatpush.bf16.msra.mxu1 %v2737_v30  ;;  %v3966_v10 = vld [vmem:[#allocation5 + $0x6a4] sm:$0xf]  ;;  %v3582_v12 = vld [vmem:[#allocation5 + $0x7b0] sm:$0xf0]  ;;  %v3329_v50 = vor.u32 %v3934_v2, %v3326_v40 }
  0xba   :  { %1982 = vmatpush.bf16.msra.mxu2 %v2865_v14  ;;  %1995 = vmatpush.bf16.msra.mxu3 %v2993_v19  ;;  %v3998_v51 = vld [vmem:[#allocation5 + $0x7a4] sm:$0xf]  ;;  %v3457_v52 = vor.u32 %v3966_v10, %v3454_v21  ;;  %v3182_v5 = vld [vmem:[#allocation5 + $0x490] sm:$0xf0] }
  0xbb   :  { %v3898_v53 = vld [vmem:[#allocation5 + $0x484] sm:$0xf]  ;;  %v3585_v1 = vor.u32 %v3998_v51, %v3582_v12  ;;  %v3310_v22 = vld [vmem:[#allocation5 + $0x590] sm:$0xf0] }
  0xbc   :  { %1957 = vmatmul.bf16.vlgmr.msra.gmra.mxu0 %v4354_v20  ;;  %1970 = vmatmul.bf16.vlgmr.msra.gmra.mxu1 %v4356_v13  ;;  %v3930_v6 = vld [vmem:[#allocation5 + $0x584] sm:$0xf]  ;;  %v3438_v58 = vld [vmem:[#allocation5 + $0x690] sm:$0xf0]  ;;  %v3185_v15 = vor.u32 %v3898_v53, %v3182_v5  ;;  %v2724_v5 = vld [vmem:[#allocation5 + $0xe8] sm:$0xf] }
  0xbd   :  { %2001 = vmatpush.bf16.msrb.mxu0 %v3233_v28  ;;  %2014 = vmatpush.bf16.msrb.mxu1 %v3361_v38  ;;  %v3962_v23 = vld [vmem:[#allocation5 + $0x684] sm:$0xf]  ;;  %v3566_v0 = vld [vmem:[#allocation5 + $0x790] sm:$0xf0]  ;;  %v3313_v8 = vor.u32 %v3930_v6, %v3310_v22  ;;  %v3785_v6 = vld [vmem:[#allocation5 + $0xf4] sm:$0xf0] }
  0xbe   :  { %2027 = vmatpush.bf16.msrb.mxu2 %v3489_v32  ;;  %2040 = vmatpush.bf16.msrb.mxu3 %v3617_v39  ;;  %v3994_v16 = vld [vmem:[#allocation5 + $0x784] sm:$0xf]  ;;  %v3441_v54 = vor.u32 %v3962_v23, %v3438_v58  ;;  %v3166_v24 = vld [vmem:[#allocation5 + $0x470] sm:$0xf0]  ;;  %v3817_v23 = vld [vmem:[#allocation5 + $0x1f4] sm:$0xf0] }
  0xbf   :  { %1983 = vmatmul.bf16.vlgmr.msra.gmra.mxu2 %v4358_v25  ;;  %1996 = vmatmul.bf16.vlgmr.msra.gmra.mxu3 %v4360_v7  ;;  %v3894_v55 = vld [vmem:[#allocation5 + $0x464] sm:$0xf]  ;;  %v3569_v56 = vor.u32 %v3994_v16, %v3566_v0  ;;  %v3294_v57 = vld [vmem:[#allocation5 + $0x570] sm:$0xf0]  ;;  %v2980_v58 = vld [vmem:[#allocation5 + $0x2e8] sm:$0xf] }
  0xc0   :  { %v3926_v27 = vld [vmem:[#allocation5 + $0x564] sm:$0xf]  ;;  %v3422_v37 = vld [vmem:[#allocation5 + $0x670] sm:$0xf0]  ;;  %v3169_v62 = vor.u32 %v3894_v55, %v3166_v24  ;;  %v3849_v16 = vld [vmem:[#allocation5 + $0x2f4] sm:$0xf0]  ;;  %v2725_v24 = vor.u32 %v3785_v6, %v2724_v5 }
  0xc1   :  { %2002 = vmatpush.bf16.msrb.mxu0 %v3217_v63  ;;  %2015 = vmatpush.bf16.msrb.mxu1 %v3345_v42  ;;  %v3958_v17 = vld [vmem:[#allocation5 + $0x664] sm:$0xf]  ;;  %v3550_v61 = vld [vmem:[#allocation5 + $0x770] sm:$0xf0]  ;;  %v3297_v4 = vor.u32 %v3926_v27, %v3294_v57  ;;  %v2708_v57 = vld [vmem:[#allocation5 + $0xc8] sm:$0xf] }
  0xc2   :  { %2028 = vmatpush.bf16.msrb.mxu2 %v3473_v60  ;;  %2041 = vmatpush.bf16.msrb.mxu3 %v3601_v45  ;;  %v3990_v9 = vld [vmem:[#allocation5 + $0x764] sm:$0xf]  ;;  %v3425_v18 = vor.u32 %v3958_v17, %v3422_v37  ;;  %v3150_v14 = vld [vmem:[#allocation5 + $0x450] sm:$0xf0]  ;;  %v3781_v17 = vld [vmem:[#allocation5 + $0xd4] sm:$0xf0] }
  0xc3   :  { %v3890_v30 = vld [vmem:[#allocation5 + $0x444] sm:$0xf]  ;;  %v3553_v26 = vor.u32 %v3990_v9, %v3550_v61  ;;  %v3278_v19 = vld [vmem:[#allocation5 + $0x550] sm:$0xf0]  ;;  %v2836_v37 = vld [vmem:[#allocation5 + $0x1c8] sm:$0xf] }
  0xc4   :  { %v3922_v48 = vld [vmem:[#allocation5 + $0x544] sm:$0xf]  ;;  %v3406_v38 = vld [vmem:[#allocation5 + $0x650] sm:$0xf0]  ;;  %v3153_v44 = vor.u32 %v3890_v30, %v3150_v14  ;;  %v3813_v61 = vld [vmem:[#allocation5 + $0x1d4] sm:$0xf0]  ;;  %v2709_v14 = vor.u32 %v3781_v17, %v2708_v57 }
  0xc5   :  { %2003 = vmatpush.bf16.msrb.mxu0 %v3201_v49  ;;  %2016 = vmatpush.bf16.msrb.mxu1 %v3329_v50  ;;  %v3954_v28 = vld [vmem:[#allocation5 + $0x644] sm:$0xf]  ;;  %v3534_v59 = vld [vmem:[#allocation5 + $0x750] sm:$0xf0]  ;;  %v3281_v3 = vor.u32 %v3922_v48, %v3278_v19  ;;  %v3877_v30 = vld [vmem:[#allocation5 + $0x3d4] sm:$0xf0]  ;;  %v2837_v48 = vor.u32 %v3813_v61, %v2836_v37 }
  0xc6   :  { %2029 = vmatpush.bf16.msrb.mxu2 %v3457_v52  ;;  %2042 = vmatpush.bf16.msrb.mxu3 %v3585_v1  ;;  %v3986_v32 = vld [vmem:[#allocation5 + $0x744] sm:$0xf]  ;;  %v3409_v39 = vor.u32 %v3954_v28, %v3406_v38  ;;  %v3134_v29 = vld [vmem:[#allocation5 + $0x430] sm:$0xf0]  ;;  %v2852_v1 = vld [vmem:[#allocation5 + $0x1e8] sm:$0xf] }
  0xc7   :  { %v3886_v35 = vld [vmem:[#allocation5 + $0x424] sm:$0xf]  ;;  %v3537_v36 = vor.u32 %v3986_v32, %v3534_v59  ;;  %v3262_v34 = vld [vmem:[#allocation5 + $0x530] sm:$0xf0]  ;;  %v2853_v27 = vor.u32 %v3817_v23, %v2852_v1  ;;  %v2692_v19 = vld [vmem:[#allocation5 + $0xa8] sm:$0xf] }
  0xc8   :  { %v3918_v33 = vld [vmem:[#allocation5 + $0x524] sm:$0xf]  ;;  %v3390_v42 = vld [vmem:[#allocation5 + $0x630] sm:$0xf0]  ;;  %v3137_v47 = vor.u32 %v3886_v35, %v3134_v29  ;;  %v3777_v28 = vld [vmem:[#allocation5 + $0xb4] sm:$0xf0] }
  0xc9   :  { %2004 = vmatpush.bf16.msrb.mxu0 %v3185_v15  ;;  %2017 = vmatpush.bf16.msrb.mxu1 %v3313_v8  ;;  %v3950_v63 = vld [vmem:[#allocation5 + $0x624] sm:$0xf]  ;;  %v3518_v46 = vld [vmem:[#allocation5 + $0x730] sm:$0xf0]  ;;  %v3265_v40 = vor.u32 %v3918_v33, %v3262_v34  ;;  %v3108_v8 = vld [vmem:[#allocation5 + $0x3e8] sm:$0xf]  ;;  %v2693_v29 = vor.u32 %v3777_v28, %v2692_v19 }
  0xca   :  { %2030 = vmatpush.bf16.msrb.mxu2 %v3441_v54  ;;  %2043 = vmatpush.bf16.msrb.mxu3 %v3569_v56  ;;  %v3982_v60 = vld [vmem:[#allocation5 + $0x724] sm:$0xf]  ;;  %v3118_v45 = vld [vmem:[#allocation5 + $0x410] sm:$0xf0]  ;;  %v3393_v10 = vor.u32 %v3950_v63, %v3390_v42  ;;  %v3881_v54 = vld [vmem:[#allocation5 + $0x3f4] sm:$0xf0]  ;;  %v2981_v56 = vor.u32 %v3849_v16, %v2980_v58 }
  0xcb   :  { %v3882_v2 = vld [vmem:[#allocation5 + $0x404] sm:$0xf]  ;;  %v3246_v51 = vld [vmem:[#allocation5 + $0x510] sm:$0xf0]  ;;  %v3521_v49 = vor.u32 %v3982_v60, %v3518_v46  ;;  %v3109_v9 = vor.u32 %v3881_v54, %v3108_v8  ;;  %v2820_v38 = vld [vmem:[#allocation5 + $0x1a8] sm:$0xf] }
  0xcc   :  { %v3914_v21 = vld [vmem:[#allocation5 + $0x504] sm:$0xf]  ;;  %v3374_v50 = vld [vmem:[#allocation5 + $0x610] sm:$0xf0]  ;;  %v3121_v22 = vor.u32 %v3882_v2, %v3118_v45  ;;  %v3809_v59 = vld [vmem:[#allocation5 + $0x1b4] sm:$0xf0] }
  0xcd   :  { %2005 = vmatpush.bf16.msrb.mxu0 %v3169_v62  ;;  %2018 = vmatpush.bf16.msrb.mxu1 %v3297_v4  ;;  %v3946_v12 = vld [vmem:[#allocation5 + $0x604] sm:$0xf]  ;;  %v3502_v53 = vld [vmem:[#allocation5 + $0x710] sm:$0xf0]  ;;  %v3249_v0 = vor.u32 %v3914_v21, %v3246_v51  ;;  %v2964_v62 = vld [vmem:[#allocation5 + $0x2c8] sm:$0xf]  ;;  %v2821_v33 = vor.u32 %v3809_v59, %v2820_v38 }
  0xce   :  { %2031 = vmatpush.bf16.msrb.mxu2 %v3425_v18  ;;  %2044 = vmatpush.bf16.msrb.mxu3 %v3553_v26  ;;  %v3978_v52 = vld [vmem:[#allocation5 + $0x704] sm:$0xf]  ;;  %v3377_v15 = vor.u32 %v3946_v12, %v3374_v50  ;;  %v3845_v4 = vld [vmem:[#allocation5 + $0x2d4] sm:$0xf0]  ;;  %v3092_v18 = vld [vmem:[#allocation5 + $0x3c8] sm:$0xf] }
  0xcf   :  { %v3505_v55 = vor.u32 %v3978_v52, %v3502_v53  ;;  %v2965_v26 = vor.u32 %v3845_v4, %v2964_v62  ;;  %v3093_v32 = vor.u32 %v3877_v30, %v3092_v18  ;;  %v3873_v35 = vld [vmem:[#allocation5 + $0x3b4] sm:$0xf0]  ;;  %v2676_v34 = vld [vmem:[#allocation5 + $0x88] sm:$0xf] }
  0xd0   :  { %v3773_v63 = vld [vmem:[#allocation5 + $0x94] sm:$0xf0]  ;;  %v2804_v42 = vld [vmem:[#allocation5 + $0x188] sm:$0xf] }
  0xd1   :  { %2006 = vmatpush.bf16.msrb.mxu0 %v3153_v44  ;;  %2019 = vmatpush.bf16.msrb.mxu1 %v3281_v3  ;;  %v2948_v44 = vld [vmem:[#allocation5 + $0x2a8] sm:$0xf]  ;;  %v3841_v3 = vld [vmem:[#allocation5 + $0x2b4] sm:$0xf0] }
  0xd2   :  { %2032 = vmatpush.bf16.msrb.mxu2 %v3409_v39  ;;  %2045 = vmatpush.bf16.msrb.mxu3 %v3537_v36  ;;  %v3076_v39 = vld [vmem:[#allocation5 + $0x3a8] sm:$0xf]  ;;  %v2949_v36 = vor.u32 %v3841_v3, %v2948_v44  ;;  %v3805_v46 = vld [vmem:[#allocation5 + $0x194] sm:$0xf0] }
  0xd3   :  { %v3077_v60 = vor.u32 %v3873_v35, %v3076_v39  ;;  %v3837_v2 = vld [vmem:[#allocation5 + $0x294] sm:$0xf0]  ;;  %v3060_v45 = vld [vmem:[#allocation5 + $0x388] sm:$0xf]  ;;  %v2805_v21 = vor.u32 %v3805_v46, %v2804_v42 }
  0xd4   :  { %v2660_v12 = vld [vmem:[#allocation5 + $0x68] sm:$0xf]  ;;  %v3801_v53 = vld [vmem:[#allocation5 + $0x174] sm:$0xf0] }
  0xd5   :  { %2007 = vmatpush.bf16.msrb.mxu0 %v3137_v47  ;;  %2020 = vmatpush.bf16.msrb.mxu1 %v3265_v40  ;;  %v2932_v47 = vld [vmem:[#allocation5 + $0x288] sm:$0xf]  ;;  %v3869_v40 = vld [vmem:[#allocation5 + $0x394] sm:$0xf0] }
  0xd6   :  { %2033 = vmatpush.bf16.msrb.mxu2 %v3393_v10  ;;  %2046 = vmatpush.bf16.msrb.mxu3 %v3521_v49  ;;  %v2677_v10 = vor.u32 %v3773_v63, %v2676_v34  ;;  %v2933_v51 = vor.u32 %v3837_v2, %v2932_v47  ;;  %v3769_v49 = vld [vmem:[#allocation5 + $0x74] sm:$0xf0]  ;;  %v2788_v50 = vld [vmem:[#allocation5 + $0x168] sm:$0xf]  ;;  %v3061_v52 = vor.u32 %v3869_v40, %v3060_v45 }
  0xd7   :  { %v2916_v5 = vld [vmem:[#allocation5 + $0x268] sm:$0xf]  ;;  %v3833_v6 = vld [vmem:[#allocation5 + $0x274] sm:$0xf0]  ;;  %v2661_v23 = vor.u32 %v3769_v49, %v2660_v12  ;;  %v2789_v58 = vor.u32 %v3801_v53, %v2788_v50 }
  0xd8   :  { %v3044_v1 = vld [vmem:[#allocation5 + $0x368] sm:$0xf]  ;;  %v2917_v16 = vor.u32 %v3833_v6, %v2916_v5  ;;  %v3861_v57 = vld [vmem:[#allocation5 + $0x354] sm:$0xf0] }
  0xd9   :  { %2008 = vmatpush.bf16.msrb.mxu0 %v3121_v22  ;;  %2021 = vmatpush.bf16.msrb.mxu1 %v3249_v0  ;;  %v3865_v22 = vld [vmem:[#allocation5 + $0x374] sm:$0xf0]  ;;  %v2644_v0 = vld [vmem:[#allocation5 + $0x48] sm:$0xf] }
  0xda   :  { %2034 = vmatpush.bf16.msrb.mxu2 %v3377_v15  ;;  %2047 = vmatpush.bf16.msrb.mxu3 %v3505_v55  ;;  %v3765_v15 = vld [vmem:[#allocation5 + $0x54] sm:$0xf0]  ;;  %v2772_v8 = vld [vmem:[#allocation5 + $0x148] sm:$0xf]  ;;  %v3045_v54 = vor.u32 %v3865_v22, %v3044_v1 }
  0xdb   :  { %v3797_v55 = vld [vmem:[#allocation5 + $0x154] sm:$0xf0]  ;;  %v2645_v17 = vor.u32 %v3765_v15, %v2644_v0  ;;  %v2628_v61 = vld [vmem:[#allocation5 + $0x28] sm:$0xf] }
  0xdc   :  { %2009 = vmatmul.bf16.vlgmr.msrb.gmra.mxu0 %v4402_v31  ;;  %2022 = vmatmul.bf16.vlgmr.msrb.gmra.mxu1 %v4404_v41  ;;  %v2773_v37 = vor.u32 %v3797_v55, %v2772_v8  ;;  %v3761_v62 = vld [vmem:[#allocation5 + $0x34] sm:$0xf0]  ;;  %v2756_v4 = vld [vmem:[#allocation5 + $0x128] sm:$0xf] }
  0xdd   :  { %2053 = vmatpush.bf16.msra.mxu0 %v2725_v24  ;;  %2066 = vmatpush.bf16.msra.mxu1 %v2853_v27  ;;  %v2900_v24 = vld [vmem:[#allocation5 + $0x248] sm:$0xf]  ;;  %v3829_v27 = vld [vmem:[#allocation5 + $0x254] sm:$0xf0]  ;;  %v2629_v28 = vor.u32 %v3761_v62, %v2628_v61 }
  0xde   :  { %2079 = vmatpush.bf16.msra.mxu2 %v2981_v56  ;;  %2092 = vmatpush.bf16.msra.mxu3 %v3109_v9  ;;  %v3028_v56 = vld [vmem:[#allocation5 + $0x348] sm:$0xf]  ;;  %v2901_v9 = vor.u32 %v3829_v27, %v2900_v24  ;;  %v3793_v30 = vld [vmem:[#allocation5 + $0x134] sm:$0xf0] }
  0xdf   :  { %2035 = vmatmul.bf16.vlgmr.msrb.gmra.mxu2 %v4406_v11  ;;  %2048 = vmatmul.bf16.vlgmr.msrb.gmra.mxu3 %v4410_v43  ;;  %v3029_v18 = vor.u32 %v3861_v57, %v3028_v56  ;;  %v3857_v19 = vld [vmem:[#allocation5 + $0x334] sm:$0xf0]  ;;  %v2612_v38 = vld [vmem:[#allocation5 + $0x8] sm:$0xf]  ;;  %v2757_v59 = vor.u32 %v3793_v30, %v2756_v4 }
  0xe0   :  { %v2740_v3 = vld [vmem:[#allocation5 + $0x108] sm:$0xf]  ;;  %v3789_v39 = vld [vmem:[#allocation5 + $0x114] sm:$0xf0] }
  0xe1   :  { %2054 = vmatpush.bf16.msra.mxu0 %v2709_v14  ;;  %2067 = vmatpush.bf16.msra.mxu1 %v2837_v48  ;;  %v2884_v14 = vld [vmem:[#allocation5 + $0x228] sm:$0xf]  ;;  %v3825_v48 = vld [vmem:[#allocation5 + $0x234] sm:$0xf0]  ;;  %v2741_v40 = vor.u32 %v3789_v39, %v2740_v3 }
  0xe2   :  { %2080 = vmatpush.bf16.msra.mxu2 %v2965_v26  ;;  %2093 = vmatpush.bf16.msra.mxu3 %v3093_v32  ;;  %v3012_v26 = vld [vmem:[#allocation5 + $0x328] sm:$0xf]  ;;  %v3757_v32 = vld [vmem:[#allocation5 + $0x14] sm:$0xf0]  ;;  %v2885_v44 = vor.u32 %v3825_v48, %v2884_v14 }
  0xe3   :  { %v2868_v35 = vld [vmem:[#allocation5 + $0x208] sm:$0xf]  ;;  %v3853_v34 = vld [vmem:[#allocation5 + $0x314] sm:$0xf0]  ;;  %v2613_v46 = vor.u32 %v3757_v32, %v2612_v38 }
  0xe4   :  { %v3236_v63 = vld [vmem:[#allocation5 + $0x4e8] sm:$0xf]  ;;  %v3913_v42 = vld [vmem:[#allocation5 + $0x4f4] sm:$0xf0] }
  0xe5   :  { %2055 = vmatpush.bf16.msra.mxu0 %v2693_v29  ;;  %2068 = vmatpush.bf16.msra.mxu1 %v2821_v33  ;;  %v3013_v29 = vor.u32 %v3857_v19, %v3012_v26  ;;  %v3821_v33 = vld [vmem:[#allocation5 + $0x214] sm:$0xf0]  ;;  %v3492_v2 = vld [vmem:[#allocation5 + $0x6e8] sm:$0xf]  ;;  %v3237_v49 = vor.u32 %v3913_v42, %v3236_v63 }
  0xe6   :  { %2081 = vmatpush.bf16.msra.mxu2 %v2949_v36  ;;  %2094 = vmatpush.bf16.msra.mxu3 %v3077_v60  ;;  %v2996_v36 = vld [vmem:[#allocation5 + $0x308] sm:$0xf]  ;;  %v3945_v47 = vld [vmem:[#allocation5 + $0x5f4] sm:$0xf0] }
  0xe7   :  { %v3364_v60 = vld [vmem:[#allocation5 + $0x5e8] sm:$0xf]  ;;  %v3977_v45 = vld [vmem:[#allocation5 + $0x6f4] sm:$0xf0]  ;;  %v2997_v12 = vor.u32 %v3853_v34, %v2996_v36 }
  0xe8   :  { %v3365_v50 = vor.u32 %v3945_v47, %v3364_v60  ;;  %v3220_v53 = vld [vmem:[#allocation5 + $0x4c8] sm:$0xf]  ;;  %v3909_v5 = vld [vmem:[#allocation5 + $0x4d4] sm:$0xf0] }
  0xe9   :  { %2056 = vmatpush.bf16.msra.mxu0 %v2677_v10  ;;  %2069 = vmatpush.bf16.msra.mxu1 %v2805_v21  ;;  %v2869_v10 = vor.u32 %v3821_v33, %v2868_v35  ;;  %v3620_v21 = vld [vmem:[#allocation5 + $0x7e8] sm:$0xf]  ;;  %v3941_v22 = vld [vmem:[#allocation5 + $0x5d4] sm:$0xf0]  ;;  %v3221_v15 = vor.u32 %v3909_v5, %v3220_v53 }
  0xea   :  { %2082 = vmatpush.bf16.msra.mxu2 %v2933_v51  ;;  %2095 = vmatpush.bf16.msra.mxu3 %v3061_v52  ;;  %v4009_v51 = vld [vmem:[#allocation5 + $0x7f4] sm:$0xf0]  ;;  %v3493_v52 = vor.u32 %v3977_v45, %v3492_v2  ;;  %v3348_v6 = vld [vmem:[#allocation5 + $0x5c8] sm:$0xf] }
  0xeb   :  { %v3621_v1 = vor.u32 %v4009_v51, %v3620_v21  ;;  %v4005_v0 = vld [vmem:[#allocation5 + $0x7d4] sm:$0xf0]  ;;  %v3349_v8 = vor.u32 %v3941_v22, %v3348_v6  ;;  %v3204_v55 = vld [vmem:[#allocation5 + $0x4a8] sm:$0xf] }
  0xec   :  { %v3905_v24 = vld [vmem:[#allocation5 + $0x4b4] sm:$0xf0]  ;;  %v3332_v27 = vld [vmem:[#allocation5 + $0x5a8] sm:$0xf] }
  0xed   :  { %2057 = vmatpush.bf16.msra.mxu0 %v2661_v23  ;;  %2070 = vmatpush.bf16.msra.mxu1 %v2789_v58  ;;  %v3476_v23 = vld [vmem:[#allocation5 + $0x6c8] sm:$0xf]  ;;  %v3973_v58 = vld [vmem:[#allocation5 + $0x6d4] sm:$0xf0]  ;;  %v3205_v62 = vor.u32 %v3905_v24, %v3204_v55 }
  0xee   :  { %2083 = vmatpush.bf16.msra.mxu2 %v2917_v16  ;;  %2096 = vmatpush.bf16.msra.mxu3 %v3045_v54  ;;  %v3604_v16 = vld [vmem:[#allocation5 + $0x7c8] sm:$0xf]  ;;  %v3477_v54 = vor.u32 %v3973_v58, %v3476_v23  ;;  %v3937_v57 = vld [vmem:[#allocation5 + $0x5b4] sm:$0xf0] }
  0xef   :  { %v3605_v56 = vor.u32 %v4005_v0, %v3604_v16  ;;  %v4001_v61 = vld [vmem:[#allocation5 + $0x7b4] sm:$0xf0]  ;;  %v3333_v4 = vor.u32 %v3937_v57, %v3332_v27  ;;  %v3188_v30 = vld [vmem:[#allocation5 + $0x488] sm:$0xf] }
  0xf0   :  { %v3901_v14 = vld [vmem:[#allocation5 + $0x494] sm:$0xf0]  ;;  %v3316_v48 = vld [vmem:[#allocation5 + $0x588] sm:$0xf] }
  0xf1   :  { %2058 = vmatpush.bf16.msra.mxu0 %v2645_v17  ;;  %2071 = vmatpush.bf16.msra.mxu1 %v2773_v37  ;;  %v3460_v17 = vld [vmem:[#allocation5 + $0x6a8] sm:$0xf]  ;;  %v3969_v37 = vld [vmem:[#allocation5 + $0x6b4] sm:$0xf0] }
  0xf2   :  { %2084 = vmatpush.bf16.msra.mxu2 %v2901_v9  ;;  %2097 = vmatpush.bf16.msra.mxu3 %v3029_v18  ;;  %v3588_v9 = vld [vmem:[#allocation5 + $0x7a8] sm:$0xf]  ;;  %v3461_v18 = vor.u32 %v3969_v37, %v3460_v17  ;;  %v3933_v19 = vld [vmem:[#allocation5 + $0x594] sm:$0xf0] }
  0xf3   :  { %v3589_v26 = vor.u32 %v4001_v61, %v3588_v9  ;;  %v3965_v38 = vld [vmem:[#allocation5 + $0x694] sm:$0xf0]  ;;  %v3572_v32 = vld [vmem:[#allocation5 + $0x788] sm:$0xf]  ;;  %v3317_v3 = vor.u32 %v3933_v19, %v3316_v48  ;;  %v2726_v48 = vld [vmem:[#allocation5 + $0xf8] sm:$0xf0] }
  0xf4   :  { %v3172_v35 = vld [vmem:[#allocation5 + $0x468] sm:$0xf]  ;;  %v3929_v34 = vld [vmem:[#allocation5 + $0x574] sm:$0xf0] }
  0xf5   :  { %2059 = vmatpush.bf16.msra.mxu0 %v2629_v28  ;;  %2072 = vmatpush.bf16.msra.mxu1 %v2757_v59  ;;  %v3444_v28 = vld [vmem:[#allocation5 + $0x688] sm:$0xf]  ;;  %v3997_v59 = vld [vmem:[#allocation5 + $0x794] sm:$0xf0] }
  0xf6   :  { %2085 = vmatpush.bf16.msra.mxu2 %v2885_v44  ;;  %2098 = vmatpush.bf16.msra.mxu3 %v3013_v29  ;;  %v3189_v44 = vor.u32 %v3901_v14, %v3188_v30  ;;  %v3445_v39 = vor.u32 %v3965_v38, %v3444_v28  ;;  %v3897_v29 = vld [vmem:[#allocation5 + $0x474] sm:$0xf0]  ;;  %v3300_v33 = vld [vmem:[#allocation5 + $0x568] sm:$0xf]  ;;  %v3573_v36 = vor.u32 %v3997_v59, %v3572_v32  ;;  %v3783_v14 = vld [vmem:[#allocation5 + $0xec] sm:$0xf] }
  0xf7   :  { %v3428_v63 = vld [vmem:[#allocation5 + $0x668] sm:$0xf]  ;;  %v3961_v42 = vld [vmem:[#allocation5 + $0x674] sm:$0xf0]  ;;  %v3173_v47 = vor.u32 %v3897_v29, %v3172_v35  ;;  %v3301_v2 = vor.u32 %v3929_v34, %v3300_v33  ;;  %v2854_v28 = vld [vmem:[#allocation5 + $0x1f8] sm:$0xf0]  ;;  %v2729_v29 = vor.u32 %v3783_v14, %v2726_v48 }
  0xf8   :  { %v3556_v60 = vld [vmem:[#allocation5 + $0x768] sm:$0xf]  ;;  %v3429_v45 = vor.u32 %v3961_v42, %v3428_v63  ;;  %v3989_v53 = vld [vmem:[#allocation5 + $0x754] sm:$0xf0]  ;;  %v3847_v38 = vld [vmem:[#allocation5 + $0x2ec] sm:$0xf] }
  0xf9   :  { %2060 = vmatpush.bf16.msra.mxu0 %v2613_v46  ;;  %2073 = vmatpush.bf16.msra.mxu1 %v2741_v40  ;;  %v3993_v46 = vld [vmem:[#allocation5 + $0x774] sm:$0xf0]  ;;  %v3156_v40 = vld [vmem:[#allocation5 + $0x448] sm:$0xf]  ;;  %v2982_v32 = vld [vmem:[#allocation5 + $0x2f8] sm:$0xf0] }
  0xfa   :  { %2086 = vmatpush.bf16.msra.mxu2 %v2869_v10  ;;  %2099 = vmatpush.bf16.msra.mxu3 %v2997_v12  ;;  %v3893_v10 = vld [vmem:[#allocation5 + $0x454] sm:$0xf0]  ;;  %v3284_v21 = vld [vmem:[#allocation5 + $0x548] sm:$0xf]  ;;  %v3557_v51 = vor.u32 %v3993_v46, %v3556_v60  ;;  %v3779_v33 = vld [vmem:[#allocation5 + $0xcc] sm:$0xf]  ;;  %v2985_v34 = vor.u32 %v3847_v38, %v2982_v32 }
  0xfb   :  { %v3925_v12 = vld [vmem:[#allocation5 + $0x554] sm:$0xf0]  ;;  %v3157_v5 = vor.u32 %v3893_v10, %v3156_v40  ;;  %v3140_v22 = vld [vmem:[#allocation5 + $0x428] sm:$0xf]  ;;  %v2710_v63 = vld [vmem:[#allocation5 + $0xd8] sm:$0xf0] }
  0xfc   :  { %2061 = vmatmul.bf16.vlgmr.msra.gmra.mxu0 %v4354_v20  ;;  %2074 = vmatmul.bf16.vlgmr.msra.gmra.mxu1 %v4356_v13  ;;  %v3285_v6 = vor.u32 %v3925_v12, %v3284_v21  ;;  %v3889_v23 = vld [vmem:[#allocation5 + $0x434] sm:$0xf0]  ;;  %v3268_v58 = vld [vmem:[#allocation5 + $0x528] sm:$0xf]  ;;  %v3811_v42 = vld [vmem:[#allocation5 + $0x1cc] sm:$0xf]  ;;  %v2713_v21 = vor.u32 %v3779_v33, %v2710_v63 }
  0xfd   :  { %2105 = vmatpush.bf16.msrb.mxu0 %v3237_v49  ;;  %2118 = vmatpush.bf16.msrb.mxu1 %v3365_v50  ;;  %v3412_v49 = vld [vmem:[#allocation5 + $0x648] sm:$0xf]  ;;  %v3957_v50 = vld [vmem:[#allocation5 + $0x654] sm:$0xf0]  ;;  %v3141_v24 = vor.u32 %v3889_v23, %v3140_v22  ;;  %v4429_v60 = vld [vmem:[%s4487_s4] sm:$0xf] }
  0xfe   :  { %2131 = vmatpush.bf16.msrb.mxu2 %v3493_v52  ;;  %2144 = vmatpush.bf16.msrb.mxu3 %v3621_v1  ;;  %v3540_v52 = vld [vmem:[#allocation5 + $0x748] sm:$0xf]  ;;  %v3413_v1 = vor.u32 %v3957_v50, %v3412_v49  ;;  %v3921_v0 = vld [vmem:[#allocation5 + $0x534] sm:$0xf0]  ;;  %v3875_v40 = vld [vmem:[#allocation5 + $0x3cc] sm:$0xf] }
  0xff   :  { %2087 = vmatmul.bf16.vlgmr.msra.gmra.mxu2 %v4358_v25  ;;  %2100 = vmatmul.bf16.vlgmr.msra.gmra.mxu3 %v4360_v7  ;;  %v3541_v16 = vor.u32 %v3989_v53, %v3540_v52  ;;  %v3985_v55 = vld [vmem:[#allocation5 + $0x734] sm:$0xf0]  ;;  %v3124_v27 = vld [vmem:[#allocation5 + $0x408] sm:$0xf]  ;;  %v3269_v57 = vor.u32 %v3921_v0, %v3268_v58  ;;  %v3094_v10 = vld [vmem:[#allocation5 + $0x3d8] sm:$0xf0] }
 0x100   :  { %v3252_v37 = vld [vmem:[#allocation5 + $0x508] sm:$0xf]  ;;  %v3917_v9 = vld [vmem:[#allocation5 + $0x514] sm:$0xf0]  ;;  %v3775_v50 = vld [vmem:[#allocation5 + $0xac] sm:$0xf] }
 0x101   :  { %2106 = vmatpush.bf16.msrb.mxu0 %v3221_v15  ;;  %2119 = vmatpush.bf16.msrb.mxu1 %v3349_v8  ;;  %v3396_v15 = vld [vmem:[#allocation5 + $0x628] sm:$0xf]  ;;  %v3953_v8 = vld [vmem:[#allocation5 + $0x634] sm:$0xf0]  ;;  %v3253_v59 = vor.u32 %v3917_v9, %v3252_v37  ;;  %v2694_v52 = vld [vmem:[#allocation5 + $0xb8] sm:$0xf0] }
 0x102   :  { %2132 = vmatpush.bf16.msrb.mxu2 %v3477_v54  ;;  %2145 = vmatpush.bf16.msrb.mxu3 %v3605_v56  ;;  %v3524_v54 = vld [vmem:[#allocation5 + $0x728] sm:$0xf]  ;;  %v3885_v56 = vld [vmem:[#allocation5 + $0x414] sm:$0xf0]  ;;  %v3397_v17 = vor.u32 %v3953_v8, %v3396_v15  ;;  %v3807_v53 = vld [vmem:[#allocation5 + $0x1ac] sm:$0xf]  ;;  %v2697_v15 = vor.u32 %v3775_v50, %v2694_v52 }
 0x103   :  { %v3380_v61 = vld [vmem:[#allocation5 + $0x608] sm:$0xf]  ;;  %v3981_v30 = vld [vmem:[#allocation5 + $0x714] sm:$0xf0]  ;;  %v3125_v19 = vor.u32 %v3885_v56, %v3124_v27  ;;  %v2950_v22 = vld [vmem:[#allocation5 + $0x2b8] sm:$0xf0] }
 0x104   :  { %v3871_v23 = vld [vmem:[#allocation5 + $0x3ac] sm:$0xf]  ;;  %v3078_v58 = vld [vmem:[#allocation5 + $0x3b8] sm:$0xf0] }
 0x105   :  { %2107 = vmatpush.bf16.msrb.mxu0 %v3205_v62  ;;  %2120 = vmatpush.bf16.msrb.mxu1 %v3333_v4  ;;  %v3525_v62 = vor.u32 %v3985_v55, %v3524_v54  ;;  %v3949_v4 = vld [vmem:[#allocation5 + $0x614] sm:$0xf0]  ;;  %v2678_v27 = vld [vmem:[#allocation5 + $0x98] sm:$0xf0]  ;;  %v3803_v56 = vld [vmem:[#allocation5 + $0x18c] sm:$0xf] }
 0x106   :  { %2133 = vmatpush.bf16.msrb.mxu2 %v3461_v18  ;;  %2146 = vmatpush.bf16.msrb.mxu3 %v3589_v26  ;;  %v3508_v18 = vld [vmem:[#allocation5 + $0x708] sm:$0xf]  ;;  %v3815_v26 = vld [vmem:[#allocation5 + $0x1ec] sm:$0xf]  ;;  %v2806_v37 = vld [vmem:[#allocation5 + $0x198] sm:$0xf0] }
 0x107   :  { %v3509_v35 = vor.u32 %v3981_v30, %v3508_v18  ;;  %v3835_v9 = vld [vmem:[#allocation5 + $0x28c] sm:$0xf]  ;;  %v2809_v30 = vor.u32 %v3803_v56, %v2806_v37 }
 0x108   :  { %v3767_v48 = vld [vmem:[#allocation5 + $0x6c] sm:$0xf] }
 0x109   :  { %2108 = vmatpush.bf16.msrb.mxu0 %v3189_v44  ;;  %2121 = vmatpush.bf16.msrb.mxu1 %v3317_v3  ;;  %v3381_v44 = vor.u32 %v3949_v4, %v3380_v61  ;;  %v3879_v3 = vld [vmem:[#allocation5 + $0x3ec] sm:$0xf]  ;;  %v2934_v61 = vld [vmem:[#allocation5 + $0x298] sm:$0xf0] }
 0x10a   :  { %2134 = vmatpush.bf16.msrb.mxu2 %v3445_v39  ;;  %2147 = vmatpush.bf16.msrb.mxu3 %v3573_v36  ;;  %v3110_v39 = vld [vmem:[#allocation5 + $0x3f8] sm:$0xf0]  ;;  %v2857_v36 = vor.u32 %v3815_v26, %v2854_v28  ;;  %v2937_v14 = vor.u32 %v3835_v9, %v2934_v61  ;;  %v3755_v56 = vld [vmem:[#allocation5 + $0xc] sm:$0xf] }
 0x10b   :  { %v3113_v46 = vor.u32 %v3879_v3, %v3110_v39  ;;  %v3062_v4 = vld [vmem:[#allocation5 + $0x398] sm:$0xf0]  ;;  %v3787_v9 = vld [vmem:[#allocation5 + $0x10c] sm:$0xf] }
 0x10c   :  { %v2662_v26 = vld [vmem:[#allocation5 + $0x78] sm:$0xf0] }
 0x10d   :  { %2109 = vmatpush.bf16.msrb.mxu0 %v3173_v47  ;;  %2122 = vmatpush.bf16.msrb.mxu1 %v3301_v2  ;;  %v2838_v47 = vld [vmem:[#allocation5 + $0x1d8] sm:$0xf0]  ;;  %v3843_v2 = vld [vmem:[#allocation5 + $0x2cc] sm:$0xf] }
 0x10e   :  { %2135 = vmatpush.bf16.msrb.mxu2 %v3429_v45  ;;  %2148 = vmatpush.bf16.msrb.mxu3 %v3557_v51  ;;  %v2966_v45 = vld [vmem:[#allocation5 + $0x2d8] sm:$0xf0]  ;;  %v557_v51 = vperm.slane %v4429_v60, 0  ;;  %v2841_v12 = vor.u32 %v3811_v42, %v2838_v47  ;;  %v3763_v47 = vld [vmem:[#allocation5 + $0x4c] sm:$0xf] }
 0x10f   :  { %v2969_v49 = vor.u32 %v3843_v2, %v2966_v45  ;;  %v2918_v3 = vld [vmem:[#allocation5 + $0x278] sm:$0xf0]  ;;  %v3795_v45 = vld [vmem:[#allocation5 + $0x14c] sm:$0xf] }
 0x110   :  { %v2646_v2 = vld [vmem:[#allocation5 + $0x58] sm:$0xf0] }
 0x111   :  { %2110 = vmatpush.bf16.msrb.mxu0 %v3157_v5  ;;  %2123 = vmatpush.bf16.msrb.mxu1 %v3285_v6  ;;  %v3097_v5 = vor.u32 %v3875_v40, %v3094_v10  ;;  %v2822_v6 = vld [vmem:[#allocation5 + $0x1b8] sm:$0xf0]  ;;  %v2649_v50 = vor.u32 %v3763_v47, %v2646_v2  ;;  %v3907_v2 = vld [vmem:[#allocation5 + $0x4cc] sm:$0xf] }
 0x112   :  { %2136 = vmatpush.bf16.msrb.mxu2 %v3413_v1  ;;  %2149 = vmatpush.bf16.msrb.mxu3 %v3541_v16  ;;  %v3839_v1 = vld [vmem:[#allocation5 + $0x2ac] sm:$0xf]  ;;  %v2825_v54 = vor.u32 %v3807_v53, %v2822_v6  ;;  %v2774_v10 = vld [vmem:[#allocation5 + $0x158] sm:$0xf0] }
 0x113   :  { %v2953_v55 = vor.u32 %v3839_v1, %v2950_v22  ;;  %v2777_v52 = vor.u32 %v3795_v45, %v2774_v10  ;;  %v2630_v6 = vld [vmem:[#allocation5 + $0x38] sm:$0xf0]  ;;  %v3791_v1 = vld [vmem:[#allocation5 + $0x12c] sm:$0xf] }
 0x114   :  { %v2742_v61 = vld [vmem:[#allocation5 + $0x118] sm:$0xf0] }
 0x115   :  { %2111 = vmatpush.bf16.msrb.mxu0 %v3141_v24  ;;  %2124 = vmatpush.bf16.msrb.mxu1 %v3269_v57  ;;  %v3771_v24 = vld [vmem:[#allocation5 + $0x8c] sm:$0xf]  ;;  %v3081_v57 = vor.u32 %v3871_v23, %v3078_v58  ;;  %v3222_v45 = vld [vmem:[#allocation5 + $0x4d8] sm:$0xf0] }
 0x116   :  { %2137 = vmatpush.bf16.msrb.mxu2 %v3397_v17  ;;  %2150 = vmatpush.bf16.msrb.mxu3 %v3525_v62  ;;  %v3867_v62 = vld [vmem:[#allocation5 + $0x38c] sm:$0xf]  ;;  %v2681_v18 = vor.u32 %v3771_v24, %v2678_v27 }
 0x117   :  { %v3065_v28 = vor.u32 %v3867_v62, %v3062_v4  ;;  %v3819_v62 = vld [vmem:[#allocation5 + $0x20c] sm:$0xf] }
 0x118   :  { %v1854_v16 = vpop.f32.mrf.mxu0  ;;  %v1867_v0 = vpop.f32.mrf.mxu1 }
 0x119   :  { %2112 = vmatpush.bf16.msrb.mxu0 %v3125_v19  ;;  %2125 = vmatpush.bf16.msrb.mxu1 %v3253_v59  ;;  %v1855_v8 = vadd.f32 %v1854_v16, %v557_v51  ;;  %v3799_v19 = vld [vmem:[#allocation5 + $0x16c] sm:$0xf]  ;;  %v2790_v59 = vld [vmem:[#allocation5 + $0x178] sm:$0xf0] }
 0x11a   :  { %2138 = vmatpush.bf16.msrb.mxu2 %v3381_v44  ;;  %2151 = vmatpush.bf16.msrb.mxu3 %v3509_v35  ;;  %v3831_v44 = vld [vmem:[#allocation5 + $0x26c] sm:$0xf]  ;;  %v2793_v42 = vor.u32 %v3799_v19, %v2790_v59  ;;  %v2902_v51 = vld [vmem:[#allocation5 + $0x258] sm:$0xf0] }
 0x11b   :  { %v1868_v17 = vadd.f32 %v1867_v0, %v1855_v8  ;;  %v3863_v35 = vld [vmem:[#allocation5 + $0x36c] sm:$0xf]  ;;  %v2758_v16 = vld [vmem:[#allocation5 + $0x138] sm:$0xf0] }
 0x11c   :  { %2113 = vmatmul.bf16.vlgmr.msrb.gmra.mxu0 %v4402_v31  ;;  %2126 = vmatmul.bf16.vlgmr.msrb.gmra.mxu1 %v4404_v41  ;;  %v3823_v0 = vld [vmem:[#allocation5 + $0x22c] sm:$0xf]  ;;  %v3494_v59 = vld [vmem:[#allocation5 + $0x6f8] sm:$0xf0] }
 0x11d   :  { %2157 = vmatpush.bf16.msra.mxu0 %v2729_v29  ;;  %2170 = vmatpush.bf16.msra.mxu1 %v2857_v36  ;;  %v3046_v29 = vld [vmem:[#allocation5 + $0x378] sm:$0xf0]  ;;  %v3855_v8 = vld [vmem:[#allocation5 + $0x32c] sm:$0xf] }
 0x11e   :  { %2183 = vmatpush.bf16.msra.mxu2 %v2985_v34  ;;  %2196 = vmatpush.bf16.msra.mxu3 %v3113_v46  ;;  %v2665_v34 = vor.u32 %v3767_v48, %v2662_v26  ;;  %v2921_v46 = vor.u32 %v3831_v44, %v2918_v3  ;;  %v3049_v40 = vor.u32 %v3863_v35, %v3046_v29  ;;  %v3911_v48 = vld [vmem:[#allocation5 + $0x4ec] sm:$0xf]  ;;  %v3238_v26 = vld [vmem:[#allocation5 + $0x4f8] sm:$0xf0] }
 0x11f   :  { %2139 = vmatmul.bf16.vlgmr.msrb.gmra.mxu2 %v4406_v11  ;;  %2152 = vmatmul.bf16.vlgmr.msrb.gmra.mxu3 %v4410_v43  ;;  %v1880_v38 = vpop.f32.mrf.mxu2  ;;  %v1893_v32 = vpop.f32.mrf.mxu3  ;;  %v3943_v19 = vld [vmem:[#allocation5 + $0x5ec] sm:$0xf]  ;;  %v2745_v44 = vor.u32 %v3787_v9, %v2742_v61  ;;  %v3622_v35 = vld [vmem:[#allocation5 + $0x7f8] sm:$0xf0] }
 0x120   :  { %v1881_v39 = vadd.f32 %v1880_v38, %v1868_v17  ;;  %v1856_v33 = vpop.f32.mrf.mxu0  ;;  %v1869_v36 = vpop.f32.mrf.mxu1  ;;  %v2761_v17 = vor.u32 %v3791_v1, %v2758_v16  ;;  %v3366_v38 = vld [vmem:[#allocation5 + $0x5f8] sm:$0xf0]  ;;  %v3903_v1 = vld [vmem:[#allocation5 + $0x4ac] sm:$0xf] }
 0x121   :  { %2158 = vmatpush.bf16.msra.mxu0 %v2713_v21  ;;  %2171 = vmatpush.bf16.msra.mxu1 %v2841_v12  ;;  %v3827_v21 = vld [vmem:[#allocation5 + $0x24c] sm:$0xf]  ;;  %v3241_v33 = vor.u32 %v3911_v48, %v3238_v26  ;;  %v3334_v16 = vld [vmem:[#allocation5 + $0x5b8] sm:$0xf0] }
 0x122   :  { %2184 = vmatpush.bf16.msra.mxu2 %v2969_v49  ;;  %2197 = vmatpush.bf16.msra.mxu3 %v3097_v5  ;;  %v4436_v63 = vadd.f32 %v1893_v32, %v1881_v39  ;;  %v3859_v12 = vld [vmem:[#allocation5 + $0x34c] sm:$0xf]  ;;  %v3030_v49 = vld [vmem:[#allocation5 + $0x358] sm:$0xf0]  ;;  %v2905_v53 = vor.u32 %v3827_v21, %v2902_v51 }
 0x123   :  { %v3759_v5 = vld [vmem:[#allocation5 + $0x2c] sm:$0xf]  ;;  %v3033_v22 = vor.u32 %v3859_v12, %v3030_v49  ;;  %v3350_v51 = vld [vmem:[#allocation5 + $0x5d8] sm:$0xf0] }
 0x124   :  { %v2633_v27 = vor.u32 %v3759_v5, %v2630_v6  ;;  %v3975_v32 = vld [vmem:[#allocation5 + $0x6ec] sm:$0xf]  ;;  %v3478_v49 = vld [vmem:[#allocation5 + $0x6d8] sm:$0xf0] }
 0x125   :  { %2159 = vmatpush.bf16.msra.mxu0 %v2697_v15  ;;  %2172 = vmatpush.bf16.msra.mxu1 %v2825_v54  ;;  %v2886_v15 = vld [vmem:[#allocation5 + $0x238] sm:$0xf0]  ;;  %v4007_v39 = vld [vmem:[#allocation5 + $0x7ec] sm:$0xf] }
 0x126   :  { %2185 = vmatpush.bf16.msra.mxu2 %v2953_v55  ;;  %2198 = vmatpush.bf16.msra.mxu3 %v3081_v57  ;;  %v3014_v54 = vld [vmem:[#allocation5 + $0x338] sm:$0xf0]  ;;  %v2889_v37 = vor.u32 %v3823_v0, %v2886_v15  ;;  %v3625_v10 = vor.u32 %v4007_v39, %v3622_v35  ;;  %v3971_v12 = vld [vmem:[#allocation5 + $0x6cc] sm:$0xf] }
 0x127   :  { %v1882_v23 = vpop.f32.mrf.mxu2  ;;  %v1895_v58 = vpop.f32.mrf.mxu3  ;;  %v2614_v57 = vld [vmem:[#allocation5 + $0x18] sm:$0xf0]  ;;  %v3017_v4 = vor.u32 %v3855_v8, %v3014_v54  ;;  %v3481_v6 = vor.u32 %v3971_v12, %v3478_v49  ;;  %v3967_v0 = vld [vmem:[#allocation5 + $0x6ac] sm:$0xf] }
 0x128   :  { %v4438_v55 = vpop.f32.mrf.mxu0  ;;  %v4440_v24 = vpop.f32.mrf.mxu1  ;;  %v3935_v23 = vld [vmem:[#allocation5 + $0x5ac] sm:$0xf]  ;;  %v3462_v15 = vld [vmem:[#allocation5 + $0x6b8] sm:$0xf0] }
 0x129   :  { %2160 = vmatpush.bf16.msra.mxu0 %v2681_v18  ;;  %2173 = vmatpush.bf16.msra.mxu1 %v2809_v30  ;;  %v2870_v18 = vld [vmem:[#allocation5 + $0x218] sm:$0xf0]  ;;  %v3851_v30 = vld [vmem:[#allocation5 + $0x30c] sm:$0xf] }
 0x12a   :  { %2186 = vmatpush.bf16.msra.mxu2 %v2937_v14  ;;  %2199 = vmatpush.bf16.msra.mxu3 %v3065_v28  ;;  %v2998_v14 = vld [vmem:[#allocation5 + $0x318] sm:$0xf0]  ;;  %v2617_v28 = vor.u32 %v3755_v56, %v2614_v57  ;;  %v2873_v3 = vor.u32 %v3819_v62, %v2870_v18  ;;  %v3999_v8 = vld [vmem:[#allocation5 + $0x7ac] sm:$0xf]  ;;  %v3337_v57 = vor.u32 %v3935_v23, %v3334_v16 }
 0x12b   :  { %v3001_v29 = vor.u32 %v3851_v30, %v2998_v14  ;;  %v3590_v54 = vld [vmem:[#allocation5 + $0x7b8] sm:$0xf0]  ;;  %v3931_v61 = vld [vmem:[#allocation5 + $0x58c] sm:$0xf] }
 0x12c   :  { %v3190_v9 = vld [vmem:[#allocation5 + $0x498] sm:$0xf0]  ;;  %v3593_v62 = vor.u32 %v3999_v8, %v3590_v54  ;;  %v3995_v30 = vld [vmem:[#allocation5 + $0x78c] sm:$0xf] }
 0x12d   :  { %2161 = vmatpush.bf16.msra.mxu0 %v2665_v34  ;;  %2174 = vmatpush.bf16.msra.mxu1 %v2793_v42  ;;  %v3369_v34 = vor.u32 %v3943_v19, %v3366_v38  ;;  %v3497_v42 = vor.u32 %v3975_v32, %v3494_v59  ;;  %v3174_v38 = vld [vmem:[#allocation5 + $0x478] sm:$0xf0]  ;;  %v3927_v32 = vld [vmem:[#allocation5 + $0x56c] sm:$0xf] }
 0x12e   :  { %2187 = vmatpush.bf16.msra.mxu2 %v2921_v46  ;;  %2200 = vmatpush.bf16.msra.mxu3 %v3049_v40  ;;  %v3939_v40 = vld [vmem:[#allocation5 + $0x5cc] sm:$0xf]  ;;  %v3430_v39 = vld [vmem:[#allocation5 + $0x678] sm:$0xf0] }
 0x12f   :  { %v4442_v36 = vpop.f32.mrf.mxu2  ;;  %v4444_v46 = vpop.f32.mrf.mxu3  ;;  %v3353_v5 = vor.u32 %v3939_v40, %v3350_v51  ;;  %v3991_v35 = vld [vmem:[#allocation5 + $0x76c] sm:$0xf]  ;;  %v3414_v12 = vld [vmem:[#allocation5 + $0x658] sm:$0xf0] }
 0x130   :  { %v1908_v47 = vpop.f32.mrf.mxu0  ;;  %v1921_v21 = vpop.f32.mrf.mxu1  ;;  %v3955_v51 = vld [vmem:[#allocation5 + $0x64c] sm:$0xf]  ;;  %v3398_v54 = vld [vmem:[#allocation5 + $0x638] sm:$0xf0] }
 0x131   :  { %2162 = vmatpush.bf16.msra.mxu0 %v2649_v50  ;;  %2175 = vmatpush.bf16.msra.mxu1 %v2777_v52  ;;  %v4003_v50 = vld [vmem:[#allocation5 + $0x7cc] sm:$0xf]  ;;  %v3606_v52 = vld [vmem:[#allocation5 + $0x7d8] sm:$0xf0] }
 0x132   :  { %2188 = vmatpush.bf16.msra.mxu2 %v2905_v53  ;;  %2201 = vmatpush.bf16.msra.mxu3 %v3033_v22  ;;  %v3225_v53 = vor.u32 %v3907_v2, %v3222_v45  ;;  %v3206_v22 = vld [vmem:[#allocation5 + $0x4b8] sm:$0xf0]  ;;  %v3609_v58 = vor.u32 %v4003_v50, %v3606_v52  ;;  %v3891_v47 = vld [vmem:[#allocation5 + $0x44c] sm:$0xf] }
 0x133   :  { %v3158_v2 = vld [vmem:[#allocation5 + $0x458] sm:$0xf0]  ;;  %v3923_v45 = vld [vmem:[#allocation5 + $0x54c] sm:$0xf] }
 0x134   :  { %v3286_v21 = vld [vmem:[#allocation5 + $0x558] sm:$0xf0]  ;;  %v3987_v52 = vld [vmem:[#allocation5 + $0x74c] sm:$0xf] }
 0x135   :  { %2163 = vmatpush.bf16.msra.mxu0 %v2633_v27  ;;  %2176 = vmatpush.bf16.msra.mxu1 %v2761_v17  ;;  %v3209_v27 = vor.u32 %v3903_v1, %v3206_v22  ;;  %v3465_v17 = vor.u32 %v3967_v0, %v3462_v15  ;;  %v3289_v1 = vor.u32 %v3923_v45, %v3286_v21  ;;  %v3887_v23 = vld [vmem:[#allocation5 + $0x42c] sm:$0xf]  ;;  %v3270_v15 = vld [vmem:[#allocation5 + $0x538] sm:$0xf0]  ;;  %v4014_v45 = vld [vmem:[#allocation7 + $0x20] sm:$0xff] }
 0x136   :  { %2189 = vmatpush.bf16.msra.mxu2 %v2889_v37  ;;  %2202 = vmatpush.bf16.msra.mxu3 %v3017_v4  ;;  %v3899_v37 = vld [vmem:[#allocation5 + $0x48c] sm:$0xf]  ;;  %v3417_v22 = vor.u32 %v3955_v51, %v3414_v12 }
 0x137   :  { %v1934_v56 = vpop.f32.mrf.mxu2  ;;  %v3963_v4 = vld [vmem:[#allocation5 + $0x68c] sm:$0xf]  ;;  %v3193_v48 = vor.u32 %v3899_v37, %v3190_v9  ;;  %v3126_v9 = vld [vmem:[#allocation5 + $0x418] sm:$0xf0] }
 0x138   :  { %v3919_v16 = vld [vmem:[#allocation5 + $0x52c] sm:$0xf]  ;;  %v3526_v56 = vld [vmem:[#allocation5 + $0x738] sm:$0xf0] }
 0x139   :  { %2164 = vmatpush.bf16.msra.mxu0 %v2617_v28  ;;  %2177 = vmatpush.bf16.msra.mxu1 %v2745_v44  ;;  %v4450_v18 = vpop.f32.mrf.mxu0  ;;  %v4452_v14 = vpop.f32.mrf.mxu1  ;;  %v3895_v28 = vld [vmem:[#allocation5 + $0x46c] sm:$0xf]  ;;  %v3302_v44 = vld [vmem:[#allocation5 + $0x578] sm:$0xf0] }
 0x13a   :  { %2190 = vmatpush.bf16.msra.mxu2 %v2873_v3  ;;  %2203 = vmatpush.bf16.msra.mxu3 %v3001_v29  ;;  %v3959_v3 = vld [vmem:[#allocation5 + $0x66c] sm:$0xf]  ;;  %v3558_v29 = vld [vmem:[#allocation5 + $0x778] sm:$0xf0] }
 0x13b   :  { %v3561_v40 = vor.u32 %v3991_v35, %v3558_v29  ;;  %v3951_v8 = vld [vmem:[#allocation5 + $0x62c] sm:$0xf]  ;;  %v4016_v35 = vld [vmem:[#allocation7 + $0x30] sm:$0xff] }
 0x13c   :  { %2165 = vmatmul.bf16.vlgmr.msra.gmra.mxu0 %v4354_v20  ;;  %2178 = vmatmul.bf16.vlgmr.msra.gmra.mxu1 %v4356_v13  ;;  %v1947_v20 = vpop.f32.mrf.mxu3  ;;  %v3318_v13 = vld [vmem:[#allocation5 + $0x598] sm:$0xf0]  ;;  %v3883_v37 = vld [vmem:[#allocation5 + $0x40c] sm:$0xf]  ;;  %v4024_v29 = vld [vmem:[#allocation7 + $0x70] sm:$0xff] }
 0x13d   :  { %2209 = vmatpush.bf16.msrb.mxu0 %v3241_v33  ;;  %2222 = vmatpush.bf16.msrb.mxu1 %v3369_v34  ;;  %v3321_v26 = vor.u32 %v3931_v61, %v3318_v13  ;;  %v3177_v33 = vor.u32 %v3895_v28, %v3174_v38  ;;  %v3305_v34 = vor.u32 %v3927_v32, %v3302_v44  ;;  %v3915_v61 = vld [vmem:[#allocation5 + $0x50c] sm:$0xf]  ;;  %v558_v32 = vperm.slane %v4429_v60, 1  ;;  %v4017_v44 = vld [vmem:[#allocation7 + $0x38] sm:$0xff] }
 0x13e   :  { %2235 = vmatpush.bf16.msrb.mxu2 %v3497_v42  ;;  %2248 = vmatpush.bf16.msrb.mxu3 %v3625_v10  ;;  %v3433_v42 = vor.u32 %v3959_v3, %v3430_v39  ;;  %v3401_v20 = vor.u32 %v3951_v8, %v3398_v54  ;;  %v4025_v3 = vld [vmem:[#allocation7 + $0x78] sm:$0xff] }
 0x13f   :  { %2191 = vmatmul.bf16.vlgmr.msra.gmra.mxu2 %v4358_v25  ;;  %2204 = vmatmul.bf16.vlgmr.msra.gmra.mxu3 %v4360_v7  ;;  %v3446_v25 = vld [vmem:[#allocation5 + $0x698] sm:$0xf0]  ;;  %v1959_v39 = vadd.f32 %v4450_v18, %v558_v32 }
 0x140   :  { %v3574_v7 = vld [vmem:[#allocation5 + $0x798] sm:$0xf0]  ;;  %v3449_v19 = vor.u32 %v3963_v4, %v3446_v25  ;;  %v3947_v25 = vld [vmem:[#allocation5 + $0x60c] sm:$0xf] }
 0x141   :  { %2210 = vmatpush.bf16.msrb.mxu0 %v3225_v53  ;;  %2223 = vmatpush.bf16.msrb.mxu1 %v3353_v5  ;;  %v3577_v59 = vor.u32 %v3995_v30, %v3574_v7  ;;  %v1960_v50 = vpop.f32.mrf.mxu0  ;;  %v3542_v53 = vld [vmem:[#allocation5 + $0x758] sm:$0xf0]  ;;  %v1973_v5 = vpop.f32.mrf.mxu1 }
 0x142   :  { %2236 = vmatpush.bf16.msrb.mxu2 %v3481_v6  ;;  %2249 = vmatpush.bf16.msrb.mxu3 %v3609_v58  ;;  %v4454_v10 = vpop.f32.mrf.mxu2  ;;  %v3161_v6 = vor.u32 %v3891_v47, %v3158_v2  ;;  %v3142_v58 = vld [vmem:[#allocation5 + $0x438] sm:$0xf0]  ;;  %v3545_v0 = vor.u32 %v3987_v52, %v3542_v53  ;;  %v4012_v5 = vld [vmem:[#allocation7 + $0x10] sm:$0xff] }
 0x143   :  { %v3254_v4 = vld [vmem:[#allocation5 + $0x518] sm:$0xf0] }
 0x144   :  { %v4456_v49 = vpop.f32.mrf.mxu3  ;;  %v3382_v30 = vld [vmem:[#allocation5 + $0x618] sm:$0xf0]  ;;  %v3257_v28 = vor.u32 %v3915_v61, %v3254_v4  ;;  %v4027_v4 = vld [vmem:[#allocation7 + $0x88] sm:$0xff] }
 0x145   :  { %2211 = vmatpush.bf16.msrb.mxu0 %v3209_v27  ;;  %2224 = vmatpush.bf16.msrb.mxu1 %v3337_v57  ;;  %v3983_v27 = vld [vmem:[#allocation5 + $0x72c] sm:$0xf]  ;;  %v3145_v57 = vor.u32 %v3887_v23, %v3142_v58  ;;  %v3385_v38 = vor.u32 %v3947_v25, %v3382_v30  ;;  %v4033_v50 = vld [vmem:[#allocation7 + $0xb8] sm:$0xff]  ;;  %v4026_v25 = vld [vmem:[#allocation7 + $0x80] sm:$0xff] }
 0x146   :  { %2237 = vmatpush.bf16.msrb.mxu2 %v3465_v17  ;;  %2250 = vmatpush.bf16.msrb.mxu3 %v3593_v62  ;;  %v3273_v17 = vor.u32 %v3919_v16, %v3270_v15  ;;  %v3529_v62 = vor.u32 %v3983_v27, %v3526_v56  ;;  %v4010_v15 = vld [vmem:[#allocation7] sm:$0xff] }
 0x147   :  { %v4030_v27 = vld [vmem:[#allocation7 + $0xa0] sm:$0xff] }
 0x149   :  { %2212 = vmatpush.bf16.msrb.mxu0 %v3193_v48  ;;  %2225 = vmatpush.bf16.msrb.mxu1 %v3321_v26  ;;  %v3979_v48 = vld [vmem:[#allocation5 + $0x70c] sm:$0xf]  ;;  %v3510_v26 = vld [vmem:[#allocation5 + $0x718] sm:$0xf0] }
 0x14a   :  { %2238 = vmatpush.bf16.msrb.mxu2 %v3449_v19  ;;  %2251 = vmatpush.bf16.msrb.mxu3 %v3577_v59  ;;  %v1986_v13 = vpop.f32.mrf.mxu2  ;;  %v3129_v19 = vor.u32 %v3883_v37, %v3126_v9  ;;  %v3513_v59 = vor.u32 %v3979_v48, %v3510_v26  ;;  %v4028_v37 = vld [vmem:[#allocation7 + $0x90] sm:$0xff] }
 0x14c   :  { %v1999_v7 = vpop.f32.mrf.mxu3 }
 0x14d   :  { %2213 = vmatpush.bf16.msrb.mxu0 %v3177_v33  ;;  %2226 = vmatpush.bf16.msrb.mxu1 %v3305_v34  ;;  %v1972_v33 = vadd.f32 %v4452_v14, %v1959_v39  ;;  %v4015_v34 = vld [vmem:[#allocation7 + $0x28] sm:$0xff]  ;;  %v4013_v14 = vld [vmem:[#allocation7 + $0x18] sm:$0xff]  ;;  %v559_v7 = vperm.slane %v4429_v60, 2 }
 0x14e   :  { %2239 = vmatpush.bf16.msrb.mxu2 %v3433_v42  ;;  %2252 = vmatpush.bf16.msrb.mxu3 %v3561_v40  ;;  %v4023_v42 = vld [vmem:[#allocation7 + $0x68] sm:$0xff]  ;;  %v4021_v40 = vld [vmem:[#allocation7 + $0x58] sm:$0xff] }
 0x14f   :  { %v1985_v18 = vadd.f32 %v4454_v10, %v1972_v33 }
 0x151   :  { %2214 = vmatpush.bf16.msrb.mxu0 %v3161_v6  ;;  %2227 = vmatpush.bf16.msrb.mxu1 %v3289_v1  ;;  %v4020_v6 = vld [vmem:[#allocation7 + $0x50] sm:$0xff] }
 0x152   :  { %2240 = vmatpush.bf16.msrb.mxu2 %v3417_v22  ;;  %2253 = vmatpush.bf16.msrb.mxu3 %v3545_v0  ;;  %v4019_v22 = vld [vmem:[#allocation7 + $0x48] sm:$0xff] }
 0x153   :  { %v4031_v0 = vld [vmem:[#allocation7 + $0xa8] sm:$0xff] }
 0x155   :  { %2215 = vmatpush.bf16.msrb.mxu0 %v3145_v57  ;;  %2228 = vmatpush.bf16.msrb.mxu1 %v3273_v17 }
 0x156   :  { %2241 = vmatpush.bf16.msrb.mxu2 %v3401_v20  ;;  %2254 = vmatpush.bf16.msrb.mxu3 %v3529_v62  ;;  %v4029_v20 = vld [vmem:[#allocation7 + $0x98] sm:$0xff] }
 0x159   :  { %2216 = vmatpush.bf16.msrb.mxu0 %v3129_v19  ;;  %2229 = vmatpush.bf16.msrb.mxu1 %v3257_v28  ;;  %v2010_v47 = vpop.f32.mrf.mxu0  ;;  %v2023_v2 = vpop.f32.mrf.mxu1 }
 0x15a   :  { %2242 = vmatpush.bf16.msrb.mxu2 %v3385_v38  ;;  %2255 = vmatpush.bf16.msrb.mxu3 %v3513_v59 }
 0x15c   :  { %2217 = vmatmul.bf16.vlgmr.msrb.gmra.mxu0 %v4402_v31  ;;  %2230 = vmatmul.bf16.vlgmr.msrb.gmra.mxu1 %v4404_v41  ;;  %v4022_v31 = vld [vmem:[#allocation7 + $0x60] sm:$0xff]  ;;  %v1998_v41 = vadd.f32 %v4456_v49, %v1985_v18 }
 0x15d   :  { %2529 = vmatpush.bf16.msra.mxu0 %v4017_v44  ;;  %2542 = vmatpush.bf16.msra.mxu1 %v4025_v3 }
 0x15e   :  { %2243 = vmatmul.bf16.vlgmr.msrb.gmra.mxu2 %v4406_v11  ;;  %2256 = vmatmul.bf16.vlgmr.msrb.gmra.mxu3 %v4410_v43  ;;  %v1907_v11 = vadd.f32 %v4438_v55, %v4436_v63  ;;  %v2011_v43 = vadd.f32 %v2010_v47, %v1998_v41  ;;  %v4011_v55 = vld [vmem:[#allocation7 + $0x8] sm:$0xff] }
 0x15f   :  { %2555 = vmatpush.bf16.msra.mxu2 %v4033_v50 }
 0x160   :  { %v1920_v51 = vadd.f32 %v4440_v24, %v1907_v11  ;;  %v2024_v52 = vadd.f32 %v2023_v2, %v2011_v43  ;;  %v4032_v24 = vld [vmem:[#allocation7 + $0xb0] sm:$0xff]  ;;  %v4039_v11 = vld [vmem:[#allocation7 + $0xe8] sm:$0xff]  ;;  %v4038_v43 = vld [vmem:[#allocation7 + $0xe0] sm:$0xff] }
 0x161   :  { %2530 = vmatpush.bf16.msra.mxu0 %v4016_v35  ;;  %2543 = vmatpush.bf16.msra.mxu1 %v4024_v29  ;;  %v2012_v12 = vpop.f32.mrf.mxu0  ;;  %v2025_v53 = vpop.f32.mrf.mxu1 }
 0x162   :  { %v2036_v21 = vpop.f32.mrf.mxu2  ;;  %v2049_v10 = vpop.f32.mrf.mxu3  ;;  %v1933_v49 = vadd.f32 %v4442_v36, %v1920_v51  ;;  %v4018_v36 = vld [vmem:[#allocation7 + $0x40] sm:$0xff]  ;;  %v4036_v51 = vld [vmem:[#allocation7 + $0xd0] sm:$0xff]  ;;  %v4035_v53 = vld [vmem:[#allocation7 + $0xc8] sm:$0xff] }
 0x163   :  { %v2037_v63 = vadd.f32 %v2036_v21, %v2024_v52  ;;  %2556 = vmatpush.bf16.msra.mxu2 %v4032_v24 }
 0x164   :  { %v1946_v1 = vadd.f32 %v4444_v46, %v1933_v49  ;;  %v560_v49 = vperm.slane %v4429_v60, 3 }
 0x165   :  { %2531 = vmatpush.bf16.msra.mxu0 %v4015_v34  ;;  %2544 = vmatpush.bf16.msra.mxu1 %v4023_v42  ;;  %v2050_v23 = vadd.f32 %v2049_v10, %v2037_v63  ;;  %v4041_v34 = vld [vmem:[#allocation7 + $0xf8] sm:$0xff] }
 0x166   :  { %v2261_v8 = vmax.f32 %v1946_v1, 0.0  ;;  %2568 = vmatpush.bf16.msra.mxu3 %v4041_v34 }
 0x167   :  { %v2262_v54 = vmax.f32 %v2050_v23, 0.0  ;;  %2557 = vmatpush.bf16.msra.mxu2 %v4031_v0 }
 0x168   :  { %v2265_v56 = vpack.c.bf16 %v2261_v8, %v2261_v8 }
 0x169   :  { %2532 = vmatpush.bf16.msra.mxu0 %v4014_v45  ;;  %2545 = vmatpush.bf16.msra.mxu1 %v4022_v31  ;;  %v2266_v46 = vpack.c.bf16 %v2262_v54, %v2262_v54  ;;  %v4040_v45 = vld [vmem:[#allocation7 + $0xf0] sm:$0xff] }
 0x16a   :  { %v2038_v58 = vpop.f32.mrf.mxu2  ;;  %v2051_v16 = vpop.f32.mrf.mxu3  ;;  %2569 = vmatpush.bf16.msra.mxu3 %v4040_v45 }
 0x16b   :  { %2558 = vmatpush.bf16.msra.mxu2 %v4030_v27 }
 0x16d   :  { %2533 = vmatpush.bf16.msra.mxu0 %v4013_v14  ;;  %2546 = vmatpush.bf16.msra.mxu1 %v4021_v40  ;;  %v4037_v40 = vld [vmem:[#allocation7 + $0xd8] sm:$0xff] }
 0x16e   :  { %2570 = vmatpush.bf16.msra.mxu3 %v4039_v11 }
 0x16f   :  { %2559 = vmatpush.bf16.msra.mxu2 %v4029_v20  ;;  %v4058_v20 = vld [vmem:[%s4489_s6] ss:$0 sm:$0xff] }
 0x171   :  { %2534 = vmatpush.bf16.msra.mxu0 %v4012_v5  ;;  %2547 = vmatpush.bf16.msra.mxu1 %v4020_v6  ;;  %v4034_v5 = vld [vmem:[#allocation7 + $0xc0] sm:$0xff] }
 0x172   :  { %2571 = vmatpush.bf16.msra.mxu3 %v4038_v43 }
 0x173   :  { %2560 = vmatpush.bf16.msra.mxu2 %v4028_v37 }
 0x175   :  { %2535 = vmatpush.bf16.msra.mxu0 %v4011_v55  ;;  %2548 = vmatpush.bf16.msra.mxu1 %v4019_v22 }
 0x176   :  { %2572 = vmatpush.bf16.msra.mxu3 %v4037_v40 }
 0x177   :  { %2561 = vmatpush.bf16.msra.mxu2 %v4027_v4 }
 0x179   :  { %2536 = vmatpush.bf16.msra.mxu0 %v4010_v15  ;;  %2549 = vmatpush.bf16.msra.mxu1 %v4018_v36  ;;  %v2062_v57 = vpop.f32.mrf.mxu0  ;;  %v2075_v17 = vpop.f32.mrf.mxu1 }
 0x17a   :  { %v2063_v26 = vadd.f32 %v2062_v57, %v559_v7  ;;  %2573 = vmatpush.bf16.msra.mxu3 %v4036_v51 }
 0x17b   :  { %2562 = vmatpush.bf16.msra.mxu2 %v4026_v25 }
 0x17c   :  { %2537 = vmatmul.bf16.vlgmr.msra.gmra.mxu0 %v2265_v56  ;;  %2550 = vmatmul.bf16.vlgmr.msra.gmra.mxu1 %v2266_v46  ;;  %v2076_v19 = vadd.f32 %v2075_v17, %v2063_v26 }
 0x17e   :  { %2574 = vmatpush.bf16.msra.mxu3 %v4035_v53 }
 0x181   :  { %v2064_v62 = vpop.f32.mrf.mxu0  ;;  %v2077_v13 = vpop.f32.mrf.mxu1 }
 0x182   :  { %v2088_v9 = vpop.f32.mrf.mxu2  ;;  %v2101_v61 = vpop.f32.mrf.mxu3  ;;  %2575 = vmatpush.bf16.msra.mxu3 %v4034_v5 }
 0x183   :  { %v2089_v28 = vadd.f32 %v2088_v9, %v2076_v19  ;;  %v4059_v19 = vld [vmem:[%s4490_s7] ss:$0 sm:$0xff] }
 0x185   :  { %v2102_v38 = vadd.f32 %v2101_v61, %v2089_v28 }
 0x18a   :  { %v2090_v30 = vpop.f32.mrf.mxu2  ;;  %v2103_v48 = vpop.f32.mrf.mxu3 }
 0x199   :  { %v2114_v32 = vpop.f32.mrf.mxu0  ;;  %v2127_v59 = vpop.f32.mrf.mxu1 }
 0x19a   :  { %v2115_v44 = vadd.f32 %v2114_v32, %v2102_v38 }
 0x19c   :  { %v2128_v3 = vadd.f32 %v2127_v59, %v2115_v44  ;;  %v4060_v59 = vld [vmem:[#allocation2] ss:$0 sm:$0xff] }
 0x1a1   :  { %v2116_v33 = vpop.f32.mrf.mxu0  ;;  %v2129_v42 = vpop.f32.mrf.mxu1 }
 0x1a2   :  { %v2140_v39 = vpop.f32.mrf.mxu2  ;;  %v2153_v29 = vpop.f32.mrf.mxu3 }
 0x1a3   :  { %v2141_v35 = vadd.f32 %v2140_v39, %v2128_v3 }
 0x1a5   :  { %v2154_v18 = vadd.f32 %v2153_v29, %v2141_v35 }
 0x1a7   :  { %v2263_v47 = vmax.f32 %v2154_v18, 0.0 }
 0x1a9   :  { %v2267_v2 = vpack.c.bf16 %v2263_v47, %v2263_v47 }
 0x1aa   :  { %v2142_v31 = vpop.f32.mrf.mxu2  ;;  %v2155_v41 = vpop.f32.mrf.mxu3 }
 0x1ab   :  { %2563 = vmatmul.bf16.vlgmr.msra.gmra.mxu2 %v2267_v2 }
 0x1b9   :  { %v2166_v14 = vpop.f32.mrf.mxu0  ;;  %v2179_v21 = vpop.f32.mrf.mxu1 }
 0x1ba   :  { %v2167_v55 = vadd.f32 %v2166_v14, %v560_v49 }
 0x1bc   :  { %v2180_v1 = vadd.f32 %v2179_v21, %v2167_v55 }
 0x1c1   :  { %v2168_v50 = vpop.f32.mrf.mxu0  ;;  %v2181_v52 = vpop.f32.mrf.mxu1 }
 0x1c2   :  { %v2192_v10 = vpop.f32.mrf.mxu2  ;;  %v2205_v12 = vpop.f32.mrf.mxu3 }
 0x1c3   :  { %v2193_v22 = vadd.f32 %v2192_v10, %v2180_v1 }
 0x1c5   :  { %v2206_v24 = vadd.f32 %v2205_v12, %v2193_v22 }
 0x1ca   :  { %v2194_v6 = vpop.f32.mrf.mxu2  ;;  %v2207_v63 = vpop.f32.mrf.mxu3 }
 0x1d9   :  { %v2218_v23 = vpop.f32.mrf.mxu0  ;;  %v2231_v58 = vpop.f32.mrf.mxu1 }
 0x1da   :  { %v2219_v16 = vadd.f32 %v2218_v23, %v2206_v24 }
 0x1dc   :  { %v2232_v0 = vadd.f32 %v2231_v58, %v2219_v16 }
 0x1e1   :  { %v2244_v15 = vpop.f32.mrf.mxu2  ;;  %v2257_v36 = vpop.f32.mrf.mxu3 }
 0x1e2   :  { %v2245_v8 = vadd.f32 %v2244_v15, %v2232_v0  ;;  %v2220_v54 = vpop.f32.mrf.mxu0  ;;  %v2233_v27 = vpop.f32.mrf.mxu1 }
 0x1e4   :  { %v2258_v56 = vadd.f32 %v2257_v36, %v2245_v8 }
 0x1e6   :  { %v2264_v46 = vmax.f32 %v2258_v56, 0.0 }
 0x1e8   :  { %v2268_v57 = vpack.c.bf16 %v2264_v46, %v2264_v46 }
 0x1e9   :  { %v2246_v60 = vpop.f32.mrf.mxu2  ;;  %v2259_v17 = vpop.f32.mrf.mxu3 }
 0x1ea   :  { %2576 = vmatmul.bf16.vlgmr.msra.gmra.mxu3 %v2268_v57 }
 0x1f9   :  { %v2538_v37 = vpop.f32.mrf.mxu0  ;;  %v2551_v61 = vpop.f32.mrf.mxu1 }
 0x1fa   :  { %v2539_v9 = vadd.f32 %v4058_v20, %v2538_v37 }
 0x1fc   :  { %v2552_v62 = vadd.f32 %v2551_v61, %v2539_v9 }
 0x201   :  { %v2540_v13 = vpop.f32.mrf.mxu0  ;;  %v2553_v4 = vpop.f32.mrf.mxu1 }
 0x22e   :  { %v2564_v25 = vpop.f32.mrf.mxu2 }
 0x22f   :  { %v2565_v7 = vadd.f32 %v2564_v25, %v2552_v62 }
 0x236   :  { %v2566_v30 = vpop.f32.mrf.mxu2 }
 0x26d   :  { %v2577_v48 = vpop.f32.mrf.mxu3 }
 0x26e   :  { %v2578_v26 = vadd.f32 %v2577_v48, %v2565_v7 }
 0x270   :  { %v2581_v28 = vmax.f32 %v2578_v26, 0.0 }
 0x272   :  { %v2586_v38 = vmul.f32 %v4059_v19, %v2581_v28 }
 0x274   :  { %2587 = vadd.xlane.f32.xlu2 %v2586_v38 }
 0x275   :  { %v2579_v32 = vpop.f32.mrf.mxu3 }
 0x2e7   :  { %v2588_v44 = vpop.xlane.xlu2 %2587 }
 0x2e8   :  { %v2593_v3 = vadd.f32 %v4060_v59, %v2588_v44 }
 0x2ea   :  { %2595 = vst.msk [vmem:[%s4492_s9] sm:$0xff] %vm2594_vm0, %v2593_v3 }
 0x2eb   :  { %2600 = vsyncpa [#allocation4], 1 }
 0x2ec   :  { %2601 = vsyncpa [#allocation6], 1 }

</bundles_post_ra>
